<compile_context>
chip_gen: v5e
topology: v5e:2x2
jax: 0.10.0
libtpu: 0.0.40
codegen_flags: <defaults>
</compile_context>

<pallas_src>
import functools

import jax
import jax.numpy as jnp
from jax.experimental import pallas as pl
from jax.experimental.pallas import tpu as pltpu

DROP_P = 0.009  # torch.nn.functional.dropout(p=0.009), training semantics
INV_KEEP = 1.0 / (1.0 - DROP_P)


def _attn_kernel(s_ref, q_ref, k_ref, v_ref, u_ref, o_ref):
    """One (batch, query-tile) per grid step.

    s_ref : SMEM (1,)        float32  -- scale divisor (PyTorch `s`)
    q_ref : VMEM (1, TQ, Dp) float32
    k_ref : VMEM (1, S,  Dp) float32
    v_ref : VMEM (1, S,  Dv) float32
    u_ref : VMEM (1, TQ, S)  float32  -- dropout uniforms in [0, 1)
    o_ref : VMEM (1, TQ, Dv)
    """
    inv_s = 1.0 / s_ref[0]                      # scalar
    q = q_ref[0] * inv_s                        # (TQ, Dp) -- fold 1/s into q
    k = k_ref[0]                                # (S, Dp)
    v = v_ref[0]                                # (S, Dv)

    # scaled = (q / s) @ k^T without materializing k.T (contract last dims).
    scaled = jax.lax.dot_general(
        q, k,
        dimension_numbers=(((1,), (1,)), ((), ())),
        preferred_element_type=jnp.float32,
    )                                           # (TQ, S)

    # Numerically stable softmax numerator + row sums (normalization deferred).
    m = jnp.max(scaled, axis=-1, keepdims=True)
    e = jnp.exp(scaled - m)                     # (TQ, S) unnormalized probs
    denom = jnp.sum(e, axis=-1, keepdims=True)  # (TQ, 1)

    # Dropout keep mask: keep with probability (1 - p).
    keep = u_ref[0] >= jnp.float32(DROP_P)      # (TQ, S)
    dropped = jnp.where(keep, e, jnp.float32(0.0))

    # P @ V on unnormalized/masked probs, then one fused per-row rescale:
    # (1 / denom) * (1 / (1 - p)).
    out = jnp.dot(dropped, v, preferred_element_type=jnp.float32)   # (TQ, Dv)
    row_scale = pl.reciprocal(denom, approx=True) * jnp.float32(INV_KEEP)
    o_ref[0] = (out * row_scale).astype(o_ref.dtype)


@functools.partial(jax.jit, static_argnames=("tq",))
def sdpa_model(q, k, v, s, dropout_uniform, *, tq=256):
    """Pallas forward pass of the Model.

    q, k            : (B, S, D)  float32
    v               : (B, S, Dv) float32
    s               : (1,)       float32 scalar divisor
    dropout_uniform : (B, S, S)  float32 uniforms in [0, 1)
    returns (B, S, Dv) float32
    """
    B, S, D = q.shape
    Dv = v.shape[-1]

    # Pad the contraction (head) dim to a lane multiple; zeros don't change qk.
    d_pad = ((D + 127) // 128) * 128
    if d_pad != D:
        pad = ((0, 0), (0, 0), (0, d_pad - D))
        q = jnp.pad(q, pad)
        k = jnp.pad(k, pad)

    # Query-row tile size (multiple of 8, divides S).
    tq = min(tq, S)
    if S % tq != 0:
        tq = S
    grid = (B, S // tq)

    return pl.pallas_call(
        _attn_kernel,
        out_shape=jax.ShapeDtypeStruct((B, S, Dv), jnp.float32),
        grid=grid,
        in_specs=[
            pl.BlockSpec(memory_space=pltpu.SMEM),                    # s
            pl.BlockSpec((1, tq, d_pad), lambda b, qi: (b, qi, 0)),   # q tile
            pl.BlockSpec((1, S, d_pad), lambda b, qi: (b, 0, 0)),     # k (full)
            pl.BlockSpec((1, S, Dv), lambda b, qi: (b, 0, 0)),        # v (full)
            pl.BlockSpec((1, tq, S), lambda b, qi: (b, qi, 0)),       # uniforms
        ],
        out_specs=pl.BlockSpec((1, tq, Dv), lambda b, qi: (b, qi, 0)),
        compiler_params=pltpu.CompilerParams(
            dimension_semantics=("parallel", "parallel"),
        ),
    )(s, q, k, v, dropout_uniform)


def reference(q, k, v, s):
    """Pure-JAX reference WITHOUT dropout (dropout is random; with p=0.009 the
    kernel output matches this in expectation)."""
    qk = jnp.einsum("bqd,bkd->bqk", q, k) / s[0]
    p = jax.nn.softmax(qk, axis=-1)
    return jnp.einsum("bqk,bkv->bqv", p, v)


if __name__ == "__main__":
    # Small shapes consistent with the module's layout (q,k: (B,S,80),
    # v: (B,S,S)).  Two query tiles per batch element exercise the tiling.
    B, S, D = 2, 256, 80
    Dv = S

    key = jax.random.PRNGKey(0)
    kq, kk, kv, ks, kd = jax.random.split(key, 5)
    q = jax.random.normal(kq, (B, S, D), dtype=jnp.float32)
    k = jax.random.normal(kk, (B, S, D), dtype=jnp.float32)
    v = jax.random.normal(kv, (B, S, Dv), dtype=jnp.float32)
    # s = torch.randn(1) in the module; keep it away from 0 so the test is sane
    s = jnp.abs(jax.random.normal(ks, (1,), dtype=jnp.float32)) + 0.5
    u = jax.random.uniform(kd, (B, S, S), dtype=jnp.float32)

    out = jax.block_until_ready(sdpa_model(q, k, v, s, u, tq=128))

    ref = reference(q, k, v, s)
    assert out.shape == ref.shape
    assert bool(jnp.isfinite(out).all())
    # With p=0.009 the dropped mask perturbs ~1% of attention mass; check the
    # deterministic part of the pipeline in aggregate.
    rel = jnp.abs(out - ref).mean() / (jnp.abs(ref).mean() + 1e-6)
    assert float(rel) < 0.2

    print("KERNEL_OK")
</pallas_src>

<mosaic_0001>
module attributes {stable_mosaic.version = 11 : i64} {
  func.func @_attn_kernel(%arg0: i32, %arg1: i32, %arg2: memref<1xf32, #tpu.memory_space<smem>>, %arg3: memref<1x128x128xf32, #tpu.memory_space<vmem>>, %arg4: memref<1x256x128xf32, #tpu.memory_space<vmem>>, %arg5: memref<1x256x256xf32, #tpu.memory_space<vmem>>, %arg6: memref<1x128x256xf32, #tpu.memory_space<vmem>>, %arg7: memref<1x128x256xf32, #tpu.memory_space<vmem>>) attributes {dimension_semantics = [#tpu.dimension_semantics<parallel>, #tpu.dimension_semantics<parallel>], iteration_bounds = array<i64: 2, 2>, scalar_prefetch = 0 : i64, scratch_operands = 0 : i64, tpu.core_type = #tpu.core_type<tc>, window_params = [{transform_indices = @transform_0, window_bounds = array<i64: 1>}, {transform_indices = @transform_1, window_bounds = array<i64: 1, 128, 128>}, {transform_indices = @transform_2, window_bounds = array<i64: 1, 256, 128>}, {transform_indices = @transform_3, window_bounds = array<i64: 1, 256, 256>}, {transform_indices = @transform_4, window_bounds = array<i64: 1, 128, 256>}, {transform_indices = @transform_5, window_bounds = array<i64: 1, 128, 256>}]} {
    %c0 = arith.constant 0 : index
    %0 = memref.load %arg2[%c0] : memref<1xf32, #tpu.memory_space<smem>>
    %cst = arith.constant 1.000000e+00 : f32
    %1 = arith.divf %cst, %0 : f32
    %c0_0 = arith.constant 0 : index
    %c0_1 = arith.constant 0 : index
    %c0_2 = arith.constant 0 : index
    %2 = vector.load %arg3[%c0_0, %c0_1, %c0_2] : memref<1x128x128xf32, #tpu.memory_space<vmem>>, vector<1x128x128xf32>
    %3 = vector.shape_cast %2 : vector<1x128x128xf32> to vector<128x128xf32>
    %4 = vector.broadcast %1 : f32 to vector<128x128xf32>
    %5 = arith.mulf %3, %4 : vector<128x128xf32>
    %c0_3 = arith.constant 0 : index
    %c0_4 = arith.constant 0 : index
    %c0_5 = arith.constant 0 : index
    %6 = vector.load %arg4[%c0_3, %c0_4, %c0_5] : memref<1x256x128xf32, #tpu.memory_space<vmem>>, vector<1x256x128xf32>
    %7 = vector.shape_cast %6 : vector<1x256x128xf32> to vector<256x128xf32>
    %c0_6 = arith.constant 0 : index
    %c0_7 = arith.constant 0 : index
    %c0_8 = arith.constant 0 : index
    %8 = vector.load %arg5[%c0_6, %c0_7, %c0_8] : memref<1x256x256xf32, #tpu.memory_space<vmem>>, vector<1x256x256xf32>
    %9 = vector.shape_cast %8 : vector<1x256x256xf32> to vector<256x256xf32>
    %cst_9 = arith.constant dense<0.000000e+00> : vector<128x256xf32>
    %10 = tpu.matmul %5, %7, %cst_9 {dimension_numbers = #tpu.dot_dimension_numbers<[1], [1], [0], [0], [0, 0, 1, 0], [], []>} : vector<128x128xf32>, vector<256x128xf32>, vector<128x256xf32> -> vector<128x256xf32>
    %cst_10 = arith.constant dense<0xFF800000> : vector<128xf32>
    %11 = vector.multi_reduction <maximumf>, %10, %cst_10 [1] : vector<128x256xf32> to vector<128xf32>
    %12 = vector.shape_cast %11 : vector<128xf32> to vector<128x1xf32>
    %13 = vector.broadcast %12 : vector<128x1xf32> to vector<128x256xf32>
    %14 = arith.subf %10, %13 : vector<128x256xf32>
    %15 = math.exp %14 : vector<128x256xf32>
    %cst_11 = arith.constant dense<0.000000e+00> : vector<128xf32>
    %16 = vector.multi_reduction <add>, %15, %cst_11 [1] : vector<128x256xf32> to vector<128xf32>
    %17 = vector.shape_cast %16 : vector<128xf32> to vector<128x1xf32>
    %c0_12 = arith.constant 0 : index
    %c0_13 = arith.constant 0 : index
    %c0_14 = arith.constant 0 : index
    %18 = vector.load %arg6[%c0_12, %c0_13, %c0_14] : memref<1x128x256xf32, #tpu.memory_space<vmem>>, vector<1x128x256xf32>
    %19 = vector.shape_cast %18 : vector<1x128x256xf32> to vector<128x256xf32>
    %cst_15 = arith.constant 0.00899999961 : f32
    %20 = vector.broadcast %cst_15 : f32 to vector<128x256xf32>
    %21 = arith.cmpf oge, %19, %20 : vector<128x256xf32>
    %cst_16 = arith.constant 0.000000e+00 : f32
    %22 = vector.broadcast %cst_16 : f32 to vector<128x256xf32>
    %23 = arith.select %21, %15, %22 : vector<128x256xi1>, vector<128x256xf32>
    %cst_17 = arith.constant dense<0.000000e+00> : vector<128x256xf32>
    %24 = tpu.matmul %23, %9, %cst_17 {dimension_numbers = #tpu.dot_dimension_numbers<[1], [0], [0], [1], [0, 0, 1, 1], [], []>} : vector<128x256xf32>, vector<256x256xf32>, vector<128x256xf32> -> vector<128x256xf32>
    %25 = tpu.reciprocal %17 {approx = true} : vector<128x1xf32> -> vector<128x1xf32>
    %cst_18 = arith.constant 1.00908172 : f32
    %26 = vector.broadcast %cst_18 : f32 to vector<128x1xf32>
    %27 = arith.mulf %25, %26 : vector<128x1xf32>
    %28 = vector.broadcast %27 : vector<128x1xf32> to vector<128x256xf32>
    %29 = arith.mulf %24, %28 : vector<128x256xf32>
    %c0_19 = arith.constant 0 : index
    %c0_20 = arith.constant 0 : index
    %c0_21 = arith.constant 0 : index
    %30 = vector.load %arg7[%c0_19, %c0_20, %c0_21] : memref<1x128x256xf32, #tpu.memory_space<vmem>>, vector<1x128x256xf32>
    %31 = vector.shape_cast %30 : vector<1x128x256xf32> to vector<128x256xf32>
    %32 = vector.shape_cast %29 : vector<128x256xf32> to vector<1x128x256xf32>
    tpu.vector_store %arg7[%c0_19, %c0_20, %c0_21], %32 {strides = array<i32>} : memref<1x128x256xf32, #tpu.memory_space<vmem>>, vector<1x128x256xf32>,
    return
  }
  func.func @transform_0(%arg0: i32, %arg1: i32) -> i32 {
    %c0_i32 = arith.constant 0 : i32
    %c0_i32_0 = arith.constant 0 : i32
    return %c0_i32 : i32
  }
  func.func @transform_1(%arg0: i32, %arg1: i32) -> (i32, i32, i32) {
    %c0_i32 = arith.constant 0 : i32
    %c0_i32_0 = arith.constant 0 : i32
    return %arg0, %arg1, %c0_i32 : i32, i32, i32
  }
  func.func @transform_2(%arg0: i32, %arg1: i32) -> (i32, i32, i32) {
    %c0_i32 = arith.constant 0 : i32
    %c0_i32_0 = arith.constant 0 : i32
    %c0_i32_1 = arith.constant 0 : i32
    return %arg0, %c0_i32, %c0_i32_0 : i32, i32, i32
  }
  func.func @transform_3(%arg0: i32, %arg1: i32) -> (i32, i32, i32) {
    %c0_i32 = arith.constant 0 : i32
    %c0_i32_0 = arith.constant 0 : i32
    %c0_i32_1 = arith.constant 0 : i32
    return %arg0, %c0_i32, %c0_i32_0 : i32, i32, i32
  }
  func.func @transform_4(%arg0: i32, %arg1: i32) -> (i32, i32, i32) {
    %c0_i32 = arith.constant 0 : i32
    %c0_i32_0 = arith.constant 0 : i32
    return %arg0, %arg1, %c0_i32 : i32, i32, i32
  }
  func.func @transform_5(%arg0: i32, %arg1: i32) -> (i32, i32, i32) {
    %c0_i32 = arith.constant 0 : i32
    %c0_i32_0 = arith.constant 0 : i32
    return %arg0, %arg1, %c0_i32 : i32, i32, i32
  }
}

</mosaic_0001>

<bundles_post_ra>
// kernel: sdpa_model.1
= control target key start
LH: loop header
LB: loop body
LE: loop exit
PB: predicated region body
PF: predicated region fallthrough
CT: control target
= control target key end

     0   :  { %s2710_s0 = inlined_call_operand.<no memory space> [shape: f32[1], index: 0, kind: input, shape index: {}]   ;;  %s2711_s1 = inlined_call_operand.vmem [shape: f32[2,256,128], index: 1, kind: input, shape index: {}]   ;;  %s2712_s2 = inlined_call_operand.vmem [shape: f32[2,256,128], index: 2, kind: input, shape index: {}]   ;;  %s2713_s3 = inlined_call_operand.vmem [shape: f32[2,256,256], index: 3, kind: input, shape index: {}]   ;;  %s2714_s4 = inlined_call_operand.vmem [shape: f32[2,256,256], index: 4, kind: input, shape index: {}]   ;;  %s2715_s5 = inlined_call_operand.hbm [shape: f32[2,256,256], index: 5, kind: output, shape index: {}]  }
   0x1   :  { %10 = sst [smem:[#allocation2]] %s2710_s0 }
   0x2   :  { %11 = vsyncpa [#allocation4], 0 }
   0x3   :  { %13 = vsyncpa [#allocation4 + $0x1], 0  ;;  %s1827_s20 = smov 0   ;;  %s1829_s21 = smov 0  }
   0x4   :  { %s1831_s22 = smov 0   ;;  %s1833_s23 = smov 0  }
   0x5   :  { %s1835_s24 = smov 0   ;;  %s1837_s25 = smov 0  }
   0x6   :  { %s1839_s26 = smov 0   ;;  %s1841_s27 = smov 0  }
   0x7 LB: > { %s1400_s0 = sadd.s32 4294967295, %s1790_s27   ;;  %s1401_s28 = sadd.s32 4294967294, %s1790_s27   ;;  %s1790_s27 = sphi %s1841_s27, %s19_s27   ;;  %s1786_s26 = sphi %s1839_s26, %s2748_s26   ;;  %s1782_s25 = sphi %s1837_s25, %s2747_s25   ;;  %s1778_s24 = sphi %s1835_s24, %s2746_s24   ;;  %s1774_s23 = sphi %s1833_s23, %s2745_s23   ;;  %s1770_s22 = sphi %s1831_s22, %s2744_s22   ;;  %s1766_s21 = sphi %s1829_s21, %s2743_s21   ;;  %s1762_s20 = sphi %s1827_s20, %s2742_s20  }
   0x8   : > { %s28_s29 = sadd.s32 1, %s1782_s25  ;;  %s31_s30 = sadd.s32 1, %s1786_s26 }
   0x9   : > { %p29_p0 = scmp.ge.s32.totalorder %s28_s29, 2  ;;  %p179_p1 = scmp.ne.s32.totalorder %s1770_s22, %s1766_s21 }
   0xa   : > { %p180_p2 = scmp.eq.s32.totalorder %s1400_s0, 3  ;;  %p185_p5 = scmp.ne.s32.totalorder %s1766_s21, %s1762_s20 }
   0xb   : > { %s2750_s29 = smov (%p29_p0, %s28_s29), 0  ;;  %s2752_s30 = smov (!%p29_p0, %s31_s30), %s1786_s26 }
   0xc   : > { %s165_s6 = ssub.s32 %s1782_s25, %s2750_s29  ;;  %p1878_p3 = por %p180_p2, %p179_p1 }
   0xd   : > { %p33_p4 = scmp.ge.s32.totalorder %s2752_s30, 2  ;;  %p186_p6 = scmp.eq.s32.totalorder %s1401_s28, 3 }
   0xe   : > { %p1404_p7 = scmp.ge.s32.totalorder %s1790_s27, 1  ;;  %p250_p9 = scmp.lt.s32.totalorder %s1790_s27, 5 }
   0xf   : > { %s2754_s30 = smov (%p33_p4, %s2752_s30), 0  ;;  %p1887_p8 = por %p186_p6, %p185_p5 }
  0x10   : > { %s164_s9 = ssub.s32 %s1786_s26, %s2754_s30  ;;  %s169_s10 = sadd.s32 1, %s1770_s22 }
  0x11   : > { %s166_s11 = sor.u32 %s165_s6, %s164_s9  ;;  %p251_p10 = pnand %p1404_p7, %p250_p9 }
  0x12   : > { %p167_p11 = scmp.eq.s32.totalorder %s166_s11, 0  ;;  %p303_p12 = scmp.lt.s32.totalorder (!%p251_p10), %s1778_s24, 1 }
  0x13   : > { %254 = sbr.rel (%p251_p10) target bundleno = 744 (0x2e8), region = 40  ;;  %s334_s13 = sld [smem:[#allocation2]] (!%p251_p10) }
  0x14   : > { %s1896_s12 = scalar_select %p167_p11, %s1770_s22, %s169_s10  }
  0x15   : > { %s1406_s14 = sshll.u32 (!%p251_p10), %s1774_s23, 4 }
  0x16   : > { %p305_p13 = scmp.lt.s32.totalorder (!%p251_p10), %s1406_s14, 31 }
  0x18   : > { %s1901_s15 = scalar_select %p303_p12, %s1778_s24, 1 }
  0x19   : > { %v335_v2 = vstv %s334_s13  ;;  %s2756_s14 = smov (!%p305_p13, %s1406_s14), 31 }
  0x1a   : > { %s1488_s16 = sshll.u32 %s1901_s15, 8  ;;  %1598 = vrcp.f32 %v335_v2  ;;  %s1414_s0 = sshll.u32 %s2756_s14, 1  ;;  %v347_v9 = vand.u32 2147483648, %v335_v2  ;;  %vm341_vm0 = vweird.f32 %v335_v2  ;;  %v345_v11 = vand.u32 2147483647, %v335_v2 }
  0x1b   : > { %s1907_s19 = scalar_lea.vmem %s2712_s2, %s1488_s16  ;;  %s1415_s28 = sshll.u32 %s1901_s15, 6 }
  0x1c   : > { %v399_v0 = vld [vmem:[%s1907_s19 + $0x78] sm:$0xff]  ;;  %v398_v3 = vld [vmem:[%s1907_s19 + $0x70] sm:$0xff]  ;;  %s1917_s6 = sadd.s32 %s1415_s28, %s1414_s0  ;;  %v397_v5 = vld [vmem:[%s1907_s19 + $0x68] sm:$0xff]  ;;  %v348_v15 = vor.u32 1.1754944e-38, %v347_v9  ;;  %vm346_vm3 = vcmp.eq.f32.partialorder %v345_v11, 8.507059e+37  ;;  %s1407_s9 = sshll.u32 %s1901_s15, 5 }
  0x1d   : > { %v415_v1 = vld [vmem:[%s1907_s19 + $0xf8] sm:$0xff]  ;;  %480 = vmatpush.xpose.msra.mxu0 %v399_v0  ;;  %v414_v4 = vld [vmem:[%s1907_s19 + $0xf0] sm:$0xff]  ;;  %v413_v6 = vld [vmem:[%s1907_s19 + $0xe8] sm:$0xff]  ;;  %s308_s10 = sadd.s32 %s1407_s9, %s2756_s14  ;;  %s1489_s18 = sshll.u32 %s1901_s15, 9 }
  0x1e   : > { %545 = vmatpush.xpose.msra.mxu1 %v415_v1  ;;  %v396_v12 = vld [vmem:[%s1907_s19 + $0x60] sm:$0xff]  ;;  %v395_v17 = vld [vmem:[%s1907_s19 + $0x58] sm:$0xff]  ;;  %v394_v21 = vld [vmem:[%s1907_s19 + $0x50] sm:$0xff]  ;;  %s1408_s11 = sshll.u32 %s308_s10, 3  ;;  %s2044_s28 = scalar_lea.vmem %s2713_s3, %s1489_s18 }
  0x1f   : > { %v412_v13 = vld [vmem:[%s1907_s19 + $0xe0] sm:$0xff]  ;;  %v411_v18 = vld [vmem:[%s1907_s19 + $0xd8] sm:$0xff]  ;;  %v410_v22 = vld [vmem:[%s1907_s19 + $0xd0] sm:$0xff]  ;;  %s1952_s17 = scalar_lea.vmem %s2711_s1, %s1408_s11  ;;  %s1416_s15 = sshll.u32 %s1917_s6, 3 }
  0x20   : > { %v1599_v7 = vpop.eup %1598  ;;  %v393_v23 = vld [vmem:[%s1907_s19 + $0x48] sm:$0xff]  ;;  %v392_v25 = vld [vmem:[%s1907_s19 + $0x40] sm:$0xff]  ;;  %v391_v27 = vld [vmem:[%s1907_s19 + $0x38] sm:$0xff]  ;;  %s2120_s11 = scalar_lea.vmem %s2714_s4, %s1416_s15  ;;  %s299_s6 = sand.u32 1, %s1766_s21  }
  0x21   : > { %481 = vmatpush.xpose.msra.mxu0 %v398_v3  ;;  %v337_v8 = vmul.f32 %v1599_v7, %v335_v2  ;;  %vm342_vm1 = vweird.f32 %v1599_v7  ;;  %v409_v24 = vld [vmem:[%s1907_s19 + $0xc8] sm:$0xff]  ;;  %v408_v26 = vld [vmem:[%s1907_s19 + $0xc0] sm:$0xff]  ;;  %v407_v28 = vld [vmem:[%s1907_s19 + $0xb8] sm:$0xff]  ;;  %s1405_s13 = sshll.u32 %s299_s6, 8 }
  0x22   : > { %546 = vmatpush.xpose.msra.mxu1 %v414_v4  ;;  %vm343_vm2 = vmor %vm341_vm0, %vm342_vm1  ;;  %v390_v29 = vld [vmem:[%s1907_s19 + $0x30] sm:$0xff]  ;;  %v389_v31 = vld [vmem:[%s1907_s19 + $0x28] sm:$0xff]  ;;  %s2540_s16 = scalar_lea.vmem [#allocation3], %s1405_s13 }
  0x23   : > { %v338_v10 = vsub.f32 1.0, %v337_v8  ;;  %v406_v30 = vld [vmem:[%s1907_s19 + $0xb0] sm:$0xff]  ;;  %v405_v32 = vld [vmem:[%s1907_s19 + $0xa8] sm:$0xff]  ;;  %v388_v33 = vld [vmem:[%s1907_s19 + $0x20] sm:$0xff]  ;;  %s1270_s9 = sshll.u32 %s2540_s16, 4  ;;  %s1271_s9 = int_to_ptr.vmem [resolvable:$true] %s1270_s9 }
  0x24   : > { %v404_v34 = vld [vmem:[%s1907_s19 + $0xa0] sm:$0xff]  ;;  %v387_v35 = vld [vmem:[%s1907_s19 + $0x18] sm:$0xff]  ;;  %v386_v37 = vld [vmem:[%s1907_s19 + $0x10] sm:$0xff] }
  0x25   : > { %482 = vmatpush.xpose.msra.mxu0 %v397_v5  ;;  %v339_v14 = vmul.f32 %v1599_v7, %v338_v10  ;;  %v403_v36 = vld [vmem:[%s1907_s19 + $0x98] sm:$0xff]  ;;  %v402_v38 = vld [vmem:[%s1907_s19 + $0x90] sm:$0xff]  ;;  %v385_v39 = vld [vmem:[%s1907_s19 + $0x8] sm:$0xff] }
  0x26   : > { %547 = vmatpush.xpose.msra.mxu1 %v413_v6  ;;  %v401_v40 = vld [vmem:[%s1907_s19 + $0x88] sm:$0xff]  ;;  %v384_v41 = vld [vmem:[%s1907_s19] sm:$0xff]  ;;  %v361_v47 = vld [vmem:[%s1952_s17 + $0x50] sm:$0xff] }
  0x27   : > { %v340_v16 = vadd.f32 %v1599_v7, %v339_v14  ;;  %v400_v42 = vld [vmem:[%s1907_s19 + $0x80] sm:$0xff]  ;;  %v360_v46 = vld [vmem:[%s1952_s17 + $0x48] sm:$0xff]  ;;  %v362_v48 = vld [vmem:[%s1952_s17 + $0x58] sm:$0xff] }
  0x28   : > { %v351_v43 = vld [vmem:[%s1952_s17] sm:$0xff]  ;;  %v364_v51 = vld [vmem:[%s1952_s17 + $0x68] sm:$0xff]  ;;  %v365_v52 = vld [vmem:[%s1952_s17 + $0x70] sm:$0xff] }
  0x29   : > { %483 = vmatpush.xpose.msra.mxu0 %v396_v12  ;;  %v344_v19 = vsel %vm343_vm2, %v1599_v7, %v340_v16  ;;  %v359_v44 = vld [vmem:[%s1952_s17 + $0x40] sm:$0xff]  ;;  %v366_v53 = vld [vmem:[%s1952_s17 + $0x78] sm:$0xff]  ;;  %v352_v62 = vld [vmem:[%s1952_s17 + $0x8] sm:$0xff] }
  0x2a   : > { %548 = vmatpush.xpose.msra.mxu1 %v412_v13  ;;  %v349_v20 = vsel %vm346_vm3, %v348_v15, %v344_v19  ;;  %v363_v50 = vld [vmem:[%s1952_s17 + $0x60] sm:$0xff]  ;;  %v353_v0 = vld [vmem:[%s1952_s17 + $0x10] sm:$0xff]  ;;  %v354_v2 = vld [vmem:[%s1952_s17 + $0x18] sm:$0xff] }
  0x2b   : > { %1523 = vpush %v349_v20  ;;  %v355_v4 = vld [vmem:[%s1952_s17 + $0x20] sm:$0xff]  ;;  %v356_v6 = vld [vmem:[%s1952_s17 + $0x28] sm:$0xff]  ;;  %v357_v8 = vld [vmem:[%s1952_s17 + $0x30] sm:$0xff] }
  0x2c   : > { %v358_v10 = vld [vmem:[%s1952_s17 + $0x38] sm:$0xff]  ;;  %s1490_s17 = sshll.u32 %s1774_s23, 5 }
  0x2d   : > { %484 = vmatpush.xpose.msra.mxu0 %v395_v17 }
  0x2e   : > { %549 = vmatpush.xpose.msra.mxu1 %v411_v18 }
  0x31   : > { %485 = vmatpush.xpose.msra.mxu0 %v394_v21 }
  0x32   : > { %550 = vmatpush.xpose.msra.mxu1 %v410_v22 }
  0x35   : > { %486 = vmatpush.xpose.msra.mxu0 %v393_v23 }
  0x36   : > { %551 = vmatpush.xpose.msra.mxu1 %v409_v24 }
  0x39   : > { %487 = vmatpush.xpose.msra.mxu0 %v392_v25 }
  0x3a   : > { %552 = vmatpush.xpose.msra.mxu1 %v408_v26 }
  0x3d   : > { %488 = vmatpush.xpose.msra.mxu0 %v391_v27 }
  0x3e   : > { %553 = vmatpush.xpose.msra.mxu1 %v407_v28 }
  0x41   : > { %489 = vmatpush.xpose.msra.mxu0 %v390_v29 }
  0x42   : > { %554 = vmatpush.xpose.msra.mxu1 %v406_v30 }
  0x45   : > { %490 = vmatpush.xpose.msra.mxu0 %v389_v31 }
  0x46   : > { %555 = vmatpush.xpose.msra.mxu1 %v405_v32 }
  0x49   : > { %491 = vmatpush.xpose.msra.mxu0 %v388_v33 }
  0x4a   : > { %556 = vmatpush.xpose.msra.mxu1 %v404_v34 }
  0x4d   : > { %492 = vmatpush.xpose.msra.mxu0 %v387_v35 }
  0x4e   : > { %557 = vmatpush.xpose.msra.mxu1 %v403_v36 }
  0x51   : > { %493 = vmatpush.xpose.msra.mxu0 %v386_v37 }
  0x52   : > { %558 = vmatpush.xpose.msra.mxu1 %v402_v38 }
  0x55   : > { %494 = vmatpush.xpose.msra.mxu0 %v385_v39 }
  0x56   : > { %559 = vmatpush.xpose.msra.mxu1 %v401_v40 }
  0x59   : > { %495 = vmatpush.xpose.msra.mxu0 %v384_v41 }
  0x5a   : > { %560 = vmatpush.xpose.msra.mxu1 %v400_v42 }
  0x5c   : > { %s1524_s14 = spop %1523 }
  0x5d   : > { %v367_v45 = vstv %s1524_s14  ;;  %s1484_s14 = sshll.u32 %s1778_s24, 6  ;;  %s1255_s24 = scalar_lea.sflag [#allocation4], %s299_s6 }
  0x5e   : > { %v368_v49 = vmul.f32 %v367_v45, %v351_v43  ;;  %v376_v54 = vmul.f32 %v367_v45, %v359_v44  ;;  %v377_v55 = vmul.f32 %v367_v45, %v360_v46  ;;  %v378_v56 = vmul.f32 %v367_v45, %v361_v47  ;;  %s1267_s18 = sadd.s32 %s1490_s17, %s1484_s14  ;;  %s1716_s14 = scalar_lea.hbm %s2715_s5, 1024 }
  0x5f   : > { %v379_v57 = vmul.f32 %v367_v45, %v362_v48  ;;  %v380_v58 = vmul.f32 %v367_v45, %v363_v50  ;;  %v381_v59 = vmul.f32 %v367_v45, %v364_v51  ;;  %v382_v60 = vmul.f32 %v367_v45, %v365_v52  ;;  %v446_v48 = vld [vmem:[%s2044_s28 + $0xf0] sm:$0xff]  ;;  %v444_v50 = vld [vmem:[%s2044_s28 + $0xe0] sm:$0xff]  ;;  %s1485_s19 = sshll.u32 %s1267_s18, 3 }
  0x60   : > { %496 = vmatmul.f32.vlgmr.msra.gmra.mxu0 %v368_v49  ;;  %561 = vmatmul.f32.vlgmr.msra.gmra.mxu1 %v368_v49  ;;  %v383_v61 = vmul.f32 %v367_v45, %v366_v53  ;;  %v369_v63 = vmul.f32 %v367_v45, %v352_v62  ;;  %v370_v1 = vmul.f32 %v367_v45, %v353_v0  ;;  %v478_v49 = vld [vmem:[%s2044_s28 + $0x1f0] sm:$0xff]  ;;  %v476_v51 = vld [vmem:[%s2044_s28 + $0x1e0] sm:$0xff]  ;;  %s1269_s15 = scalar_lea.hbm %s2715_s5, %s1485_s19 }
  0x61   : > { %v371_v3 = vmul.f32 %v367_v45, %v354_v2  ;;  %v372_v5 = vmul.f32 %v367_v45, %v355_v4  ;;  %v373_v7 = vmul.f32 %v367_v45, %v356_v6  ;;  %v374_v9 = vmul.f32 %v367_v45, %v357_v8  ;;  %1491 = vmatpush.msra.mxu2 %v446_v48  ;;  %v442_v52 = vld [vmem:[%s2044_s28 + $0xd0] sm:$0xff]  ;;  %v436_v62 = vld [vmem:[%s2044_s28 + $0xa0] sm:$0xff]  ;;  %s1272_s23 = sshll.u32 %s1269_s15, 4  ;;  %s1273_s23 = int_to_ptr.hbm [resolvable:$true] %s1272_s23 }
  0x62   : > { %v375_v11 = vmul.f32 %v367_v45, %v358_v10  ;;  %1507 = vmatpush.msra.mxu3 %v478_v49  ;;  %v474_v53 = vld [vmem:[%s2044_s28 + $0x1d0] sm:$0xff]  ;;  %898 = vmatpush.msrb.mxu0 %v446_v48  ;;  %v464_v8 = vld [vmem:[%s2044_s28 + $0x180] sm:$0xff]  ;;  %s1710_s10 = sshra.s32 %s1273_s23, 4  ;;  %s1711_s10 = int_to_ptr.hbm [resolvable:$true] %s1710_s10 }
  0x63   : > { %963 = vmatpush.msrb.mxu1 %v478_v49  ;;  %1492 = vmatpush.msra.mxu2 %v444_v50  ;;  %v434_v0 = vld [vmem:[%s2044_s28 + $0x90] sm:$0xff]  ;;  %p1717_p4 = scmp.lt.s32.totalorder %s1711_s10, %s2715_s5 }
  0x64   : > { %1508 = vmatpush.msra.mxu3 %v476_v51  ;;  %899 = vmatpush.msrb.mxu0 %v444_v50  ;;  %v462_v10 = vld [vmem:[%s2044_s28 + $0x170] sm:$0xff]  ;;  %v420_v50 = vld [vmem:[%s2044_s28 + $0x20] sm:$0xff] }
  0x65   : > { %964 = vmatpush.msrb.mxu1 %v476_v51  ;;  %1493 = vmatpush.msra.mxu2 %v442_v52  ;;  %v422_v48 = vld [vmem:[%s2044_s28 + $0x30] sm:$0xff]  ;;  %v452_v51 = vld [vmem:[%s2044_s28 + $0x120] sm:$0xff] }
  0x66   : > { %1509 = vmatpush.msra.mxu3 %v474_v53  ;;  %900 = vmatpush.msrb.mxu0 %v442_v52  ;;  %v454_v49 = vld [vmem:[%s2044_s28 + $0x130] sm:$0xff] }
  0x67   : > { %965 = vmatpush.msrb.mxu1 %v474_v53  ;;  %v418_v52 = vld [vmem:[%s2044_s28 + $0x10] sm:$0xff] }
  0x68   : > { %499 = vmatmul.f32.gmra.mxu0 %v369_v63  ;;  %564 = vmatmul.f32.gmra.mxu1 %v369_v63  ;;  %v468_v63 = vld [vmem:[%s2044_s28 + $0x1a0] sm:$0xff]  ;;  %v450_v53 = vld [vmem:[%s2044_s28 + $0x110] sm:$0xff] }
  0x70   : > { %502 = vmatmul.f32.gmra.mxu0 %v370_v1  ;;  %567 = vmatmul.f32.gmra.mxu1 %v370_v1  ;;  %v466_v1 = vld [vmem:[%s2044_s28 + $0x190] sm:$0xff] }
  0x78   : > { %505 = vmatmul.f32.gmra.mxu0 %v371_v3  ;;  %570 = vmatmul.f32.gmra.mxu1 %v371_v3 }
  0x80   : > { %508 = vmatmul.f32.gmra.mxu0 %v372_v5  ;;  %573 = vmatmul.f32.gmra.mxu1 %v372_v5 }
  0x88   : > { %511 = vmatmul.f32.gmra.mxu0 %v373_v7  ;;  %576 = vmatmul.f32.gmra.mxu1 %v373_v7  ;;  %v432_v7 = vld [vmem:[%s2044_s28 + $0x80] sm:$0xff] }
  0x90   : > { %514 = vmatmul.f32.gmra.mxu0 %v374_v9  ;;  %579 = vmatmul.f32.gmra.mxu1 %v374_v9  ;;  %v430_v9 = vld [vmem:[%s2044_s28 + $0x70] sm:$0xff] }
  0x98   : > { %517 = vmatmul.f32.gmra.mxu0 %v375_v11  ;;  %582 = vmatmul.f32.gmra.mxu1 %v375_v11  ;;  %v428_v11 = vld [vmem:[%s2044_s28 + $0x60] sm:$0xff] }
  0xa0   : > { %520 = vmatmul.f32.gmra.mxu0 %v376_v54  ;;  %585 = vmatmul.f32.gmra.mxu1 %v376_v54 }
  0xa8   : > { %523 = vmatmul.f32.gmra.mxu0 %v377_v55  ;;  %588 = vmatmul.f32.gmra.mxu1 %v377_v55 }
  0xb0   : > { %526 = vmatmul.f32.gmra.mxu0 %v378_v56  ;;  %591 = vmatmul.f32.gmra.mxu1 %v378_v56 }
  0xb8   : > { %529 = vmatmul.f32.gmra.mxu0 %v379_v57  ;;  %594 = vmatmul.f32.gmra.mxu1 %v379_v57 }
  0xc0   : > { %532 = vmatmul.f32.gmra.mxu0 %v380_v58  ;;  %597 = vmatmul.f32.gmra.mxu1 %v380_v58  ;;  %v440_v58 = vld [vmem:[%s2044_s28 + $0xc0] sm:$0xff] }
  0xc1   : > { %1494 = vmatpush.msra.mxu2 %v440_v58  ;;  %901 = vmatpush.msrb.mxu0 %v440_v58  ;;  %v447_v58 = vld [vmem:[%s2044_s28 + $0xf8] sm:$0xff] }
  0xc8   : > { %535 = vmatmul.f32.gmra.mxu0 %v381_v59  ;;  %600 = vmatmul.f32.gmra.mxu1 %v381_v59  ;;  %v472_v59 = vld [vmem:[%s2044_s28 + $0x1c0] sm:$0xff] }
  0xc9   : > { %1510 = vmatpush.msra.mxu3 %v472_v59  ;;  %966 = vmatpush.msrb.mxu1 %v472_v59  ;;  %v479_v59 = vld [vmem:[%s2044_s28 + $0x1f8] sm:$0xff] }
  0xd0   : > { %538 = vmatmul.f32.gmra.mxu0 %v382_v60  ;;  %603 = vmatmul.f32.gmra.mxu1 %v382_v60  ;;  %v438_v60 = vld [vmem:[%s2044_s28 + $0xb0] sm:$0xff] }
  0xd1   : > { %1495 = vmatpush.msra.mxu2 %v438_v60  ;;  %902 = vmatpush.msrb.mxu0 %v438_v60  ;;  %v445_v60 = vld [vmem:[%s2044_s28 + $0xe8] sm:$0xff] }
  0xd3   : > { %1496 = vmatpush.msra.mxu2 %v436_v62  ;;  %903 = vmatpush.msrb.mxu0 %v436_v62  ;;  %v443_v62 = vld [vmem:[%s2044_s28 + $0xd8] sm:$0xff] }
  0xd5   : > { %1497 = vmatpush.msra.mxu2 %v434_v0  ;;  %904 = vmatpush.msrb.mxu0 %v434_v0  ;;  %v441_v0 = vld [vmem:[%s2044_s28 + $0xc8] sm:$0xff] }
  0xd7   : > { %1498 = vmatpush.msra.mxu2 %v432_v7  ;;  %905 = vmatpush.msrb.mxu0 %v432_v7 }
  0xd8   : > { %541 = vmatmul.f32.gmra.mxu0 %v383_v61  ;;  %606 = vmatmul.f32.gmra.mxu1 %v383_v61  ;;  %v470_v61 = vld [vmem:[%s2044_s28 + $0x1b0] sm:$0xff] }
  0xd9   : > { %1511 = vmatpush.msra.mxu3 %v470_v61  ;;  %967 = vmatpush.msrb.mxu1 %v470_v61  ;;  %v477_v61 = vld [vmem:[%s2044_s28 + $0x1e8] sm:$0xff] }
  0xda   : > { %1499 = vmatpush.msra.mxu2 %v430_v9  ;;  %906 = vmatpush.msrb.mxu0 %v430_v9 }
  0xdb   : > { %1512 = vmatpush.msra.mxu3 %v468_v63  ;;  %968 = vmatpush.msrb.mxu1 %v468_v63  ;;  %v475_v63 = vld [vmem:[%s2044_s28 + $0x1d8] sm:$0xff] }
  0xdc   : > { %1500 = vmatpush.msra.mxu2 %v428_v11  ;;  %907 = vmatpush.msrb.mxu0 %v428_v11  ;;  %v2123_v11 = vld [vmem:[%s2120_s11 + $0x60] sm:$0xff] }
  0xdd   : > { %v1970_v12 = vpop.f32.mrf.mxu0  ;;  %v1972_v13 = vpop.f32.mrf.mxu1  ;;  %1513 = vmatpush.msra.mxu3 %v466_v1  ;;  %969 = vmatpush.msrb.mxu1 %v466_v1  ;;  %v473_v1 = vld [vmem:[%s2044_s28 + $0x1c8] sm:$0xff]  ;;  %vm846_vm4 = vcmp.ge.f32.partialorder %v2123_v11, 0.009 }
  0xde   : > { %v610_v56 = vmax.f32 %v1970_v12, %v1972_v13 }
  0xdf   : > { %1514 = vmatpush.msra.mxu3 %v464_v8  ;;  %970 = vmatpush.msrb.mxu1 %v464_v8 }
  0xe1   : > { %1515 = vmatpush.msra.mxu3 %v462_v10  ;;  %971 = vmatpush.msrb.mxu1 %v462_v10 }
  0xe5   : > { %v1974_v14 = vpop.f32.mrf.mxu0  ;;  %v1976_v15 = vpop.f32.mrf.mxu1 }
  0xe6   : > { %v613_v5 = vmax.f32 %v1974_v14, %v1976_v15 }
  0xed   : > { %v1978_v16 = vpop.f32.mrf.mxu0  ;;  %v1980_v17 = vpop.f32.mrf.mxu1 }
  0xf5   : > { %v1982_v18 = vpop.f32.mrf.mxu0  ;;  %v1984_v19 = vpop.f32.mrf.mxu1 }
  0xf6   : > { %v619_v4 = vmax.f32 %v1982_v18, %v1984_v19 }
  0xfd   : > { %v1986_v20 = vpop.f32.mrf.mxu0  ;;  %v1988_v21 = vpop.f32.mrf.mxu1 }
 0x105   : > { %v1990_v22 = vpop.f32.mrf.mxu0  ;;  %v1992_v23 = vpop.f32.mrf.mxu1 }
 0x10d   : > { %v1994_v24 = vpop.f32.mrf.mxu0  ;;  %v1996_v25 = vpop.f32.mrf.mxu1 }
 0x10e   : > { %v628_v26 = vmax.f32 %v1994_v24, %v1996_v25 }
 0x110   : > { %629 = vmax.xlane.f32.xlu0 %v628_v26  ;;  %v460_v26 = vld [vmem:[%s2044_s28 + $0x160] sm:$0xff] }
 0x111   : > { %1516 = vmatpush.msra.mxu3 %v460_v26  ;;  %972 = vmatpush.msrb.mxu1 %v460_v26  ;;  %v437_v26 = vld [vmem:[%s2044_s28 + $0xa8] sm:$0xff] }
 0x115   : > { %v2000_v27 = vpop.f32.mrf.mxu0  ;;  %v2002_v28 = vpop.f32.mrf.mxu1 }
 0x116   : > { %v631_v29 = vmax.f32 %v2000_v27, %v2002_v28 }
 0x118   : > { %632 = vmax.xlane.f32.xlu0 %v631_v29  ;;  %v622_v29 = vmax.f32 %v1986_v20, %v1988_v21 }
 0x11d   : > { %v2006_v30 = vpop.f32.mrf.mxu0  ;;  %v2008_v31 = vpop.f32.mrf.mxu1 }
 0x11e   : > { %v634_v32 = vmax.f32 %v2006_v30, %v2008_v31 }
 0x120   : > { %635 = vmax.xlane.f32.xlu1 %v634_v32  ;;  %v616_v32 = vmax.f32 %v1978_v16, %v1980_v17 }
 0x125   : > { %v2012_v33 = vpop.f32.mrf.mxu0  ;;  %v2014_v34 = vpop.f32.mrf.mxu1 }
 0x126   : > { %v637_v35 = vmax.f32 %v2012_v33, %v2014_v34 }
 0x128   : > { %638 = vmax.xlane.f32.xlu1 %v637_v35  ;;  %v625_v35 = vmax.f32 %v1990_v22, %v1992_v23 }
 0x12d   : > { %v2018_v36 = vpop.f32.mrf.mxu0  ;;  %v2020_v37 = vpop.f32.mrf.mxu1 }
 0x12e   : > { %v640_v38 = vmax.f32 %v2018_v36, %v2020_v37 }
 0x130   : > { %641 = vmax.xlane.f32.xlu2 %v640_v38  ;;  %v426_v38 = vld [vmem:[%s2044_s28 + $0x50] sm:$0xff] }
 0x131   : > { %1501 = vmatpush.msra.mxu2 %v426_v38  ;;  %908 = vmatpush.msrb.mxu0 %v426_v38 }
 0x135   : > { %v2024_v39 = vpop.f32.mrf.mxu0  ;;  %v2026_v40 = vpop.f32.mrf.mxu1 }
 0x136   : > { %v643_v41 = vmax.f32 %v2024_v39, %v2026_v40 }
 0x138   : > { %644 = vmax.xlane.f32.xlu2 %v643_v41  ;;  %v458_v41 = vld [vmem:[%s2044_s28 + $0x150] sm:$0xff] }
 0x139   : > { %1517 = vmatpush.msra.mxu3 %v458_v41  ;;  %973 = vmatpush.msrb.mxu1 %v458_v41 }
 0x13d   : > { %v2030_v42 = vpop.f32.mrf.mxu0  ;;  %v2032_v43 = vpop.f32.mrf.mxu1 }
 0x13e   : > { %v646_v44 = vmax.f32 %v2030_v42, %v2032_v43 }
 0x140   : > { %647 = vmax.xlane.f32.xlu0 %v646_v44  ;;  %v424_v44 = vld [vmem:[%s2044_s28 + $0x40] sm:$0xff] }
 0x141   : > { %1502 = vmatpush.msra.mxu2 %v424_v44  ;;  %909 = vmatpush.msrb.mxu0 %v424_v44 }
 0x143   : > { %1503 = vmatpush.msra.mxu2 %v422_v48  ;;  %910 = vmatpush.msrb.mxu0 %v422_v48  ;;  %v467_v48 = vld [vmem:[%s2044_s28 + $0x198] sm:$0xff] }
 0x145   : > { %v2037_v45 = vpop.f32.mrf.mxu0  ;;  %v2039_v46 = vpop.f32.mrf.mxu1  ;;  %1504 = vmatpush.msra.mxu2 %v420_v50  ;;  %911 = vmatpush.msrb.mxu0 %v420_v50  ;;  %v433_v50 = vld [vmem:[%s2044_s28 + $0x88] sm:$0xff] }
 0x146   : > { %v649_v47 = vmax.f32 %v2037_v45, %v2039_v46 }
 0x147   : > { %1505 = vmatpush.msra.mxu2 %v418_v52  ;;  %912 = vmatpush.msrb.mxu0 %v418_v52 }
 0x148   : > { %650 = vmax.xlane.f32.xlu1 %v649_v47  ;;  %v456_v47 = vld [vmem:[%s2044_s28 + $0x140] sm:$0xff] }
 0x149   : > { %1518 = vmatpush.msra.mxu3 %v456_v47  ;;  %974 = vmatpush.msrb.mxu1 %v456_v47 }
 0x14b   : > { %1519 = vmatpush.msra.mxu3 %v454_v49  ;;  %975 = vmatpush.msrb.mxu1 %v454_v49  ;;  %v2150_v49 = vld [vmem:[%s2120_s11 + $0x78] sm:$0xff] }
 0x14c   : > { %vm849_vm7 = vcmp.ge.f32.partialorder %v2150_v49, 0.009 }
 0x14d   : > { %v2054_v54 = vpop.f32.mrf.mxu0  ;;  %v2056_v55 = vpop.f32.mrf.mxu1  ;;  %1520 = vmatpush.msra.mxu3 %v452_v51  ;;  %976 = vmatpush.msrb.mxu1 %v452_v51  ;;  %v465_v51 = vld [vmem:[%s2044_s28 + $0x188] sm:$0xff] }
 0x14e   : > { %v652_v57 = vmax.f32 %v2054_v54, %v2056_v55 }
 0x14f   : > { %1521 = vmatpush.msra.mxu3 %v450_v53  ;;  %977 = vmatpush.msrb.mxu1 %v450_v53 }
 0x150   : > { %611 = vmax.xlane.f32.xlu1 %v610_v56  ;;  %653 = vmax.xlane.f32.xlu2 %v652_v57  ;;  %v416_v56 = vld [vmem:[%s2044_s28] sm:$0xff] }
 0x151   : > { %v448_v57 = vld [vmem:[%s2044_s28 + $0x100] sm:$0xff]  ;;  %1506 = vmatpush.msra.mxu2 %v416_v56  ;;  %913 = vmatpush.msrb.mxu0 %v416_v56 }
 0x152   : > { %1522 = vmatpush.msra.mxu3 %v448_v57  ;;  %978 = vmatpush.msrb.mxu1 %v448_v57 }
 0x153   : > { %1028 = vmatpush.msrb.mxu2 %v447_v58 }
 0x154   : > { %1093 = vmatpush.msrb.mxu3 %v479_v59 }
 0x155   : > { %v2070_v2 = vpop.f32.mrf.mxu0  ;;  %v2072_v3 = vpop.f32.mrf.mxu1  ;;  %1029 = vmatpush.msrb.mxu2 %v445_v60 }
 0x156   : > { %v655_v6 = vmax.f32 %v2070_v2, %v2072_v3  ;;  %1094 = vmatpush.msrb.mxu3 %v477_v61  ;;  %v2173_v61 = vld [vmem:[%s2120_s11 + $0x88] sm:$0xff] }
 0x157   : > { %1030 = vmatpush.msrb.mxu2 %v443_v62  ;;  %v463_v62 = vld [vmem:[%s2044_s28 + $0x178] sm:$0xff]  ;;  %vm851_vm9 = vcmp.ge.f32.partialorder %v2173_v61, 0.009 }
 0x158   : > { %620 = vmax.xlane.f32.xlu1 %v619_v4  ;;  %614 = vmax.xlane.f32.xlu2 %v613_v5  ;;  %v439_v4 = vld [vmem:[%s2044_s28 + $0xb8] sm:$0xff] }
 0x159   : > { %656 = vmax.xlane.f32.xlu0 %v655_v6  ;;  %1095 = vmatpush.msrb.mxu3 %v475_v63  ;;  %v471_v5 = vld [vmem:[%s2044_s28 + $0x1b8] sm:$0xff] }
 0x15a   : > { %1031 = vmatpush.msrb.mxu2 %v441_v0 }
 0x15b   : > { %1096 = vmatpush.msrb.mxu3 %v473_v1 }
 0x15c   : > { %1032 = vmatpush.msrb.mxu2 %v439_v4 }
 0x15d   : > { %1097 = vmatpush.msrb.mxu3 %v471_v5 }
 0x15e   : > { %1033 = vmatpush.msrb.mxu2 %v437_v26  ;;  %v459_v26 = vld [vmem:[%s2044_s28 + $0x158] sm:$0xff] }
 0x160   : > { %623 = vmax.xlane.f32.xlu2 %v622_v29  ;;  %v2127_v29 = vld [vmem:[%s2120_s11 + $0x68] sm:$0xff] }
 0x161   : > { %617 = vmax.xlane.f32.xlu0 %v616_v32  ;;  %vm847_vm5 = vcmp.ge.f32.partialorder %v2127_v29, 0.009 }
 0x169   : > { %626 = vmax.xlane.f32.xlu0 %v625_v35 }
 0x183   : > { %v630_v6 = vpop.xlane.xlu0 %629 }
 0x184   : > { %v670_v7 = vsub.f32 %v1994_v24, %v630_v6  ;;  %v671_v8 = vsub.f32 %v1996_v25, %v630_v6  ;;  %v469_v24 = vld [vmem:[%s2044_s28 + $0x1a8] sm:$0xff] }
 0x185   : > { %1098 = vmatpush.msrb.mxu3 %v469_v24 }
 0x186   : > { %v714_v9 = vmul.f32 1.442695, %v670_v7  ;;  %v716_v10 = vmul.f32 1.442695, %v671_v8  ;;  %v461_v8 = vld [vmem:[%s2044_s28 + $0x168] sm:$0xff] }
 0x187   : > { %1099 = vmatpush.msrb.mxu3 %v467_v48 }
 0x188   : > { %1600 = vpow2.f32 %v714_v9  ;;  %v2196_v9 = vld [vmem:[%s2120_s11 + $0x98] sm:$0xff] }
 0x189   : > { %1602 = vpow2.f32 %v716_v10  ;;  %1100 = vmatpush.msrb.mxu3 %v465_v51  ;;  %v427_v10 = vld [vmem:[%s2044_s28 + $0x58] sm:$0xff]  ;;  %vm853_vm11 = vcmp.ge.f32.partialorder %v2196_v9, 0.009  ;;  %v457_v51 = vld [vmem:[%s2044_s28 + $0x148] sm:$0xff] }
 0x18b   : > { %v633_v25 = vpop.xlane.xlu0 %632  ;;  %1101 = vmatpush.msrb.mxu3 %v463_v62 }
 0x18c   : > { %v672_v32 = vsub.f32 %v2000_v27, %v633_v25  ;;  %v673_v35 = vsub.f32 %v2002_v28, %v633_v25  ;;  %v2145_v27 = vld [vmem:[%s2120_s11 + $0x70] sm:$0xff]  ;;  %v435_v28 = vld [vmem:[%s2044_s28 + $0x98] sm:$0xff] }
 0x18d   : > { %1034 = vmatpush.msrb.mxu2 %v435_v28  ;;  %vm848_vm6 = vcmp.ge.f32.partialorder %v2145_v27, 0.009  ;;  %1102 = vmatpush.msrb.mxu3 %v461_v8 }
 0x18e   : > { %v2134_v38 = vpop.eup %1600  ;;  %v718_v41 = vmul.f32 1.442695, %v672_v32  ;;  %v720_v44 = vmul.f32 1.442695, %v673_v35 }
 0x18f   : > { %v2136_v47 = vpop.eup %1602  ;;  %1423 = vmatmul.msk.f32.vlgmr.msra.gmra.mxu2 %vm846_vm4, %v2134_v38  ;;  %1103 = vmatpush.msrb.mxu3 %v459_v26 }
 0x190   : > { %1604 = vpow2.f32 %v718_v41  ;;  %1439 = vmatmul.msk.f32.vlgmr.msra.gmra.mxu3 %vm847_vm5, %v2136_v47  ;;  %1035 = vmatpush.msrb.mxu2 %v433_v50  ;;  %v425_v50 = vld [vmem:[%s2044_s28 + $0x48] sm:$0xff] }
 0x191   : > { %1606 = vpow2.f32 %v720_v44  ;;  %1104 = vmatpush.msrb.mxu3 %v457_v51  ;;  %v449_v51 = vld [vmem:[%s2044_s28 + $0x108] sm:$0xff] }
 0x193   : > { %v636_v52 = vpop.xlane.xlu1 %635 }
 0x194   : > { %v674_v53 = vsub.f32 %v2006_v30, %v636_v52  ;;  %v675_v56 = vsub.f32 %v2008_v31, %v636_v52  ;;  %v2169_v30 = vld [vmem:[%s2120_s11 + $0x80] sm:$0xff]  ;;  %v431_v31 = vld [vmem:[%s2044_s28 + $0x78] sm:$0xff] }
 0x195   : > { %1036 = vmatpush.msrb.mxu2 %v431_v31  ;;  %vm850_vm8 = vcmp.ge.f32.partialorder %v2169_v30, 0.009  ;;  %v423_v52 = vld [vmem:[%s2044_s28 + $0x38] sm:$0xff] }
 0x196   : > { %v2158_v57 = vpop.eup %1604  ;;  %v722_v58 = vmul.f32 1.442695, %v674_v53  ;;  %v724_v59 = vmul.f32 1.442695, %v675_v56 }
 0x197   : > { %v2160_v60 = vpop.eup %1606  ;;  %1424 = vmatmul.msk.f32.gmra.mxu2 %vm848_vm6, %v2158_v57 }
 0x198   : > { %1608 = vpow2.f32 %v722_v58  ;;  %1440 = vmatmul.msk.f32.gmra.mxu3 %vm849_vm7, %v2160_v60  ;;  %v455_v58 = vld [vmem:[%s2044_s28 + $0x138] sm:$0xff] }
 0x199   : > { %1610 = vpow2.f32 %v724_v59  ;;  %1105 = vmatpush.msrb.mxu3 %v455_v58 }
 0x19b   : > { %v639_v63 = vpop.xlane.xlu1 %638 }
 0x19c   : > { %v676_v0 = vsub.f32 %v2012_v33, %v639_v63  ;;  %v677_v1 = vsub.f32 %v2014_v34, %v639_v63  ;;  %v2191_v33 = vld [vmem:[%s2120_s11 + $0x90] sm:$0xff]  ;;  %v429_v34 = vld [vmem:[%s2044_s28 + $0x68] sm:$0xff]  ;;  %v2242_v63 = vld [vmem:[%s2120_s11 + $0xb8] sm:$0xff] }
 0x19d   : > { %1037 = vmatpush.msrb.mxu2 %v429_v34  ;;  %vm852_vm10 = vcmp.ge.f32.partialorder %v2191_v33, 0.009  ;;  %vm2722_vm15 = vcmp.ge.f32.partialorder %v2242_v63, 0.009  ;;  %v453_v34 = vld [vmem:[%s2044_s28 + $0x128] sm:$0xff] }
 0x19e   : > { %v2180_v4 = vpop.eup %1608  ;;  %v726_v5 = vmul.f32 1.442695, %v676_v0  ;;  %v728_v6 = vmul.f32 1.442695, %v677_v1  ;;  %1106 = vmatpush.msrb.mxu3 %v453_v34 }
 0x19f   : > { %v2182_v7 = vpop.eup %1610  ;;  %1425 = vmatmul.msk.f32.gmra.mxu2 %vm850_vm8, %v2180_v4 }
 0x1a0   : > { %1612 = vpow2.f32 %v726_v5  ;;  %1441 = vmatmul.msk.f32.gmra.mxu3 %vm851_vm9, %v2182_v7  ;;  %1038 = vmatpush.msrb.mxu2 %v427_v10 }
 0x1a1   : > { %1614 = vpow2.f32 %v728_v6  ;;  %v421_v6 = vld [vmem:[%s2044_s28 + $0x28] sm:$0xff] }
 0x1a2   : > { %1039 = vmatpush.msrb.mxu2 %v425_v50  ;;  %v417_v50 = vld [vmem:[%s2044_s28 + $0x8] sm:$0xff] }
 0x1a3   : > { %v642_v24 = vpop.xlane.xlu2 %641 }
 0x1a4   : > { %v678_v25 = vsub.f32 %v2018_v36, %v642_v24  ;;  %v679_v32 = vsub.f32 %v2020_v37, %v642_v24  ;;  %v2215_v36 = vld [vmem:[%s2120_s11 + $0xa0] sm:$0xff]  ;;  %v2218_v37 = vld [vmem:[%s2120_s11 + $0xa8] sm:$0xff]  ;;  %1040 = vmatpush.msrb.mxu2 %v423_v52 }
 0x1a5   : > { %vm2727_vm12 = vcmp.ge.f32.partialorder %v2215_v36, 0.009  ;;  %vm2724_vm13 = vcmp.ge.f32.partialorder %v2218_v37, 0.009  ;;  %v2264_v24 = vld [vmem:[%s2120_s11 + $0xc8] sm:$0xff] }
 0x1a6   : > { %v2204_v35 = vpop.eup %1612  ;;  %v730_v41 = vmul.f32 1.442695, %v678_v25  ;;  %v732_v44 = vmul.f32 1.442695, %v679_v32  ;;  %1041 = vmatpush.msrb.mxu2 %v421_v6  ;;  %v419_v32 = vld [vmem:[%s2044_s28 + $0x18] sm:$0xff] }
 0x1a7   : > { %v2206_v28 = vpop.eup %1614  ;;  %1426 = vmatmul.msk.f32.gmra.mxu2 %vm852_vm10, %v2204_v35  ;;  %vm2716_vm1 = vcmp.ge.f32.partialorder %v2264_v24, 0.009 }
 0x1a8   : > { %1616 = vpow2.f32 %v730_v41  ;;  %1442 = vmatmul.msk.f32.gmra.mxu3 %vm853_vm11, %v2206_v28  ;;  %v451_v41 = vld [vmem:[%s2044_s28 + $0x118] sm:$0xff]  ;;  %1042 = vmatpush.msrb.mxu2 %v419_v32 }
 0x1a9   : > { %1618 = vpow2.f32 %v732_v44  ;;  %1107 = vmatpush.msrb.mxu3 %v451_v41 }
 0x1aa   : > { %1043 = vmatpush.msrb.mxu2 %v417_v50 }
 0x1ab   : > { %v645_v48 = vpop.xlane.xlu2 %644  ;;  %1108 = vmatpush.msrb.mxu3 %v449_v51 }
 0x1ac   : > { %v680_v53 = vsub.f32 %v2024_v39, %v645_v48  ;;  %v681_v56 = vsub.f32 %v2026_v40, %v645_v48  ;;  %v2239_v40 = vld [vmem:[%s2120_s11 + $0xb0] sm:$0xff] }
 0x1ad   : > { %vm2723_vm14 = vcmp.ge.f32.partialorder %v2239_v40, 0.009 }
 0x1ae   : > { %v2228_v59 = vpop.eup %1616  ;;  %v734_v31 = vmul.f32 1.442695, %v680_v53  ;;  %v736_v62 = vmul.f32 1.442695, %v681_v56 }
 0x1af   : > { %v2230_v39 = vpop.eup %1618  ;;  %1427 = vmatmul.msk.f32.gmra.mxu2 %vm2727_vm12, %v2228_v59 }
 0x1b0   : > { %1620 = vpow2.f32 %v734_v31  ;;  %1443 = vmatmul.msk.f32.gmra.mxu3 %vm2724_vm13, %v2230_v39 }
 0x1b1   : > { %1622 = vpow2.f32 %v736_v62 }
 0x1b3   : > { %v648_v0 = vpop.xlane.xlu0 %647 }
 0x1b4   : > { %v682_v1 = vsub.f32 %v2030_v42, %v648_v0  ;;  %v683_v5 = vsub.f32 %v2032_v43, %v648_v0  ;;  %v2261_v43 = vld [vmem:[%s2120_s11 + $0xc0] sm:$0xff] }
 0x1b5   : > { %vm2719_vm0 = vcmp.ge.f32.partialorder %v2261_v43, 0.009 }
 0x1b6   : > { %v2250_v8 = vpop.eup %1620  ;;  %v738_v10 = vmul.f32 1.442695, %v682_v1  ;;  %v740_v26 = vmul.f32 1.442695, %v683_v5 }
 0x1b7   : > { %v2252_v42 = vpop.eup %1622  ;;  %1428 = vmatmul.msk.f32.gmra.mxu2 %vm2723_vm14, %v2250_v8 }
 0x1b8   : > { %1624 = vpow2.f32 %v738_v10  ;;  %1444 = vmatmul.msk.f32.gmra.mxu3 %vm2722_vm15, %v2252_v42 }
 0x1b9   : > { %1626 = vpow2.f32 %v740_v26 }
 0x1bb   : > { %v651_v25 = vpop.xlane.xlu1 %650 }
 0x1bc   : > { %v684_v44 = vsub.f32 %v2037_v45, %v651_v25  ;;  %v685_v48 = vsub.f32 %v2039_v46, %v651_v25  ;;  %v2285_v45 = vld [vmem:[%s2120_s11 + $0xd0] sm:$0xff]  ;;  %v2288_v46 = vld [vmem:[%s2120_s11 + $0xd8] sm:$0xff] }
 0x1bd   : > { %vm2718_vm2 = vcmp.ge.f32.partialorder %v2285_v45, 0.009  ;;  %vm2717_vm3 = vcmp.ge.f32.partialorder %v2288_v46, 0.009 }
 0x1be   : > { %v2274_v52 = vpop.eup %1624  ;;  %v742_v53 = vmul.f32 1.442695, %v684_v44  ;;  %v744_v56 = vmul.f32 1.442695, %v685_v48 }
 0x1bf   : > { %v2276_v58 = vpop.eup %1626  ;;  %1429 = vmatmul.msk.f32.gmra.mxu2 %vm2719_vm0, %v2274_v52 }
 0x1c0   : > { %1628 = vpow2.f32 %v742_v53  ;;  %1445 = vmatmul.msk.f32.gmra.mxu3 %vm2716_vm1, %v2276_v58 }
 0x1c1   : > { %1630 = vpow2.f32 %v744_v56 }
 0x1c3   : > { %v612_v31 = vpop.xlane.xlu1 %611  ;;  %v654_v62 = vpop.xlane.xlu2 %653 }
 0x1c4   : > { %v658_v0 = vsub.f32 %v1970_v12, %v612_v31  ;;  %v659_v1 = vsub.f32 %v1972_v13, %v612_v31  ;;  %v686_v5 = vsub.f32 %v2054_v54, %v654_v62  ;;  %v687_v6 = vsub.f32 %v2056_v55, %v654_v62  ;;  %v2307_v12 = vld [vmem:[%s2120_s11] sm:$0xff]  ;;  %v2313_v54 = vld [vmem:[%s2120_s11 + $0x8] sm:$0xff] }
 0x1c5   : > { %v2310_v13 = vld [vmem:[%s2120_s11 + $0xe0] sm:$0xff]  ;;  %vm834_vm1 = vcmp.ge.f32.partialorder %v2307_v12, 0.009  ;;  %v2321_v31 = vld [vmem:[%s2120_s11 + $0xe8] sm:$0xff] }
 0x1c6   : > { %v2296_v34 = vpop.eup %1628  ;;  %v690_v10 = vmul.f32 1.442695, %v658_v0  ;;  %v692_v26 = vmul.f32 1.442695, %v659_v1  ;;  %v746_v25 = vmul.f32 1.442695, %v686_v5 }
 0x1c7   : > { %v2298_v32 = vpop.eup %1630  ;;  %v748_v41 = vmul.f32 1.442695, %v687_v6  ;;  %1430 = vmatmul.msk.f32.gmra.mxu2 %vm2718_vm2, %v2296_v34  ;;  %vm835_vm2 = vcmp.ge.f32.partialorder %v2313_v54, 0.009  ;;  %vm2720_vm0 = vcmp.ge.f32.partialorder %v2321_v31, 0.009  ;;  %v775_v54 = vadd.f32 %v2160_v60, %v2158_v57 }
 0x1c8   : > { %1632 = vpow2.f32 %v690_v10  ;;  %1446 = vmatmul.msk.f32.gmra.mxu3 %vm2717_vm3, %v2298_v32  ;;  %vm2721_vm3 = vcmp.ge.f32.partialorder %v2310_v13, 0.009 }
 0x1c9   : > { %1634 = vpow2.f32 %v692_v26 }
 0x1ca   : > { %1636 = vpow2.f32 %v746_v25  ;;  %v2351_v25 = vld [vmem:[%s2120_s11 + $0x10] sm:$0xff] }
 0x1cb   : > { %1638 = vpow2.f32 %v748_v41  ;;  %v621_v55 = vpop.xlane.xlu1 %620  ;;  %v615_v44 = vpop.xlane.xlu2 %614 }
 0x1cc   : > { %v664_v48 = vsub.f32 %v1982_v18, %v621_v55  ;;  %v665_v50 = vsub.f32 %v1984_v19, %v621_v55  ;;  %v660_v51 = vsub.f32 %v1974_v14, %v615_v44  ;;  %v661_v53 = vsub.f32 %v1976_v15, %v615_v44  ;;  %v657_v56 = vpop.xlane.xlu0 %656 }
 0x1cd   : > { %v688_v62 = vsub.f32 %v2070_v2, %v657_v56  ;;  %v689_v0 = vsub.f32 %v2072_v3, %v657_v56  ;;  %v2362_v56 = vld [vmem:[%s2120_s11 + $0xf0] sm:$0xff] }
 0x1ce   : > { %v2327_v1 = vpop.eup %1632  ;;  %v702_v18 = vmul.f32 1.442695, %v664_v48  ;;  %v704_v5 = vmul.f32 1.442695, %v665_v50  ;;  %v694_v19 = vmul.f32 1.442695, %v660_v51 }
 0x1cf   : > { %v2329_v6 = vpop.eup %1634  ;;  %v696_v14 = vmul.f32 1.442695, %v661_v53  ;;  %1417 = vmatmul.msk.f32.vlgmr.msrb.gmra.mxu0 %vm834_vm1, %v2327_v1  ;;  %v750_v2 = vmul.f32 1.442695, %v688_v62  ;;  %v752_v26 = vmul.f32 1.442695, %v689_v0 }
 0x1d0   : > { %v2335_v15 = vpop.eup %1636  ;;  %1640 = vpow2.f32 %v702_v18  ;;  %1433 = vmatmul.msk.f32.vlgmr.msrb.gmra.mxu1 %vm835_vm2, %v2329_v6  ;;  %v754_v3 = vadd.f32 %v2329_v6, %v2327_v1  ;;  %v2356_v50 = vld [vmem:[%s2120_s11 + $0x18] sm:$0xff]  ;;  %vm2725_vm15 = vcmp.ge.f32.partialorder %v2362_v56, 0.009 }
 0x1d1   : > { %v2342_v10 = vpop.eup %1638  ;;  %1642 = vpow2.f32 %v704_v5  ;;  %1431 = vmatmul.msk.f32.gmra.mxu2 %vm2721_vm3, %v2335_v15  ;;  %v2367_v5 = vld [vmem:[%s2120_s11 + $0xf8] sm:$0xff]  ;;  %vm837_vm3 = vcmp.ge.f32.partialorder %v2356_v50, 0.009  ;;  %v778_v50 = vadd.f32 %v2182_v7, %v2180_v4 }
 0x1d2   : > { %1644 = vpow2.f32 %v694_v19  ;;  %1447 = vmatmul.msk.f32.gmra.mxu3 %vm2720_vm0, %v2342_v10  ;;  %755 = vadd.xlane.f32.xlu1 %v754_v3  ;;  %vm836_vm0 = vcmp.ge.f32.partialorder %v2351_v25, 0.009  ;;  %vm2726_vm14 = vcmp.ge.f32.partialorder %v2367_v5, 0.009  ;;  %v784_v25 = vadd.f32 %v2230_v39, %v2228_v59 }
 0x1d3   : > { %1646 = vpow2.f32 %v696_v14  ;;  %v624_v41 = vpop.xlane.xlu2 %623 }
 0x1d4   : > { %1648 = vpow2.f32 %v750_v2  ;;  %v666_v55 = vsub.f32 %v1986_v20, %v624_v41  ;;  %v667_v44 = vsub.f32 %v1988_v21, %v624_v41  ;;  %v618_v48 = vpop.xlane.xlu0 %617  ;;  %v806_v41 = vld [vmem:[%s2120_s11 + $0x20] sm:$0xff] }
 0x1d5   : > { %1650 = vpow2.f32 %v752_v26  ;;  %v662_v51 = vsub.f32 %v1978_v16, %v618_v48  ;;  %v663_v53 = vsub.f32 %v1980_v17, %v618_v48  ;;  %vm838_vm13 = vcmp.ge.f32.partialorder %v806_v41, 0.009 }
 0x1d6   : > { %v2364_v62 = vpop.eup %1640  ;;  %v706_v0 = vmul.f32 1.442695, %v666_v55  ;;  %v708_v18 = vmul.f32 1.442695, %v667_v44  ;;  %v807_v44 = vld [vmem:[%s2120_s11 + $0x28] sm:$0xff]  ;;  %v793_v41 = vadd.f32 %v2298_v32, %v2296_v34 }
 0x1d7   : > { %v2369_v20 = vpop.eup %1642  ;;  %v698_v21 = vmul.f32 1.442695, %v662_v51  ;;  %v700_v19 = vmul.f32 1.442695, %v663_v53 }
 0x1d8   : > { %v1645_v14 = vpop.eup %1644  ;;  %1652 = vpow2.f32 %v706_v0  ;;  %v763_v16 = vadd.f32 %v2369_v20, %v2364_v62 }
 0x1d9   : > { %v1647_v17 = vpop.eup %1646  ;;  %1654 = vpow2.f32 %v708_v18  ;;  %1418 = vmatmul.msk.f32.gmra.mxu0 %vm836_vm0, %v1645_v14 }
 0x1da   : > { %v2378_v2 = vpop.eup %1648  ;;  %1656 = vpow2.f32 %v698_v21  ;;  %1434 = vmatmul.msk.f32.gmra.mxu1 %vm837_vm3, %v1647_v17  ;;  %764 = vadd.xlane.f32.xlu1 %v763_v16  ;;  %v757_v3 = vadd.f32 %v1647_v17, %v1645_v14  ;;  %v772_v16 = vadd.f32 %v2136_v47, %v2134_v38 }
 0x1db   : > { %v2382_v26 = vpop.eup %1650  ;;  %1658 = vpow2.f32 %v700_v19  ;;  %1432 = vmatmul.msk.f32.gmra.mxu2 %vm2725_vm15, %v2378_v2  ;;  %vm839_vm15 = vcmp.ge.f32.partialorder %v807_v44, 0.009  ;;  %v787_v44 = vadd.f32 %v2252_v42, %v2250_v8 }
 0x1dc   : > { %1448 = vmatmul.msk.f32.gmra.mxu3 %vm2726_vm14, %v2382_v26  ;;  %758 = vadd.xlane.f32.xlu2 %v757_v3  ;;  %v627_v55 = vpop.xlane.xlu0 %626 }
 0x1dd   : > { %v668_v48 = vsub.f32 %v1990_v22, %v627_v55  ;;  %v669_v51 = vsub.f32 %v1992_v23, %v627_v55  ;;  %v808_v55 = vld [vmem:[%s2120_s11 + $0x30] sm:$0xff] }
 0x1de   : > { %v2394_v53 = vpop.eup %1652  ;;  %vm840_vm14 = vcmp.ge.f32.partialorder %v808_v55, 0.009 }
 0x1df   : > { %v2396_v0 = vpop.eup %1654  ;;  %v710_v18 = vmul.f32 1.442695, %v668_v48  ;;  %v712_v21 = vmul.f32 1.442695, %v669_v51  ;;  %v809_v48 = vld [vmem:[%s2120_s11 + $0x38] sm:$0xff] }
 0x1e0   : > { %v1657_v19 = vpop.eup %1656  ;;  %v766_v3 = vadd.f32 %v2396_v0, %v2394_v53  ;;  %vm841_vm12 = vcmp.ge.f32.partialorder %v809_v48, 0.009 }
 0x1e1   : > { %v1659_v22 = vpop.eup %1658  ;;  %1660 = vpow2.f32 %v710_v18  ;;  %1419 = vmatmul.msk.f32.gmra.mxu0 %vm838_vm13, %v1657_v19 }
 0x1e2   : > { %1662 = vpow2.f32 %v712_v21  ;;  %1435 = vmatmul.msk.f32.gmra.mxu1 %vm839_vm15, %v1659_v22  ;;  %773 = vadd.xlane.f32.xlu1 %v772_v16  ;;  %v760_v23 = vadd.f32 %v1659_v22, %v1657_v19  ;;  %v781_v21 = vadd.f32 %v2206_v28, %v2204_v35  ;;  %v790_v16 = vadd.f32 %v2276_v58, %v2274_v52 }
 0x1e3   : > { %1449 = vmatmul.msk.f32.vlgmr.msrb.gmra.mxu2 %vm834_vm1, %v2327_v1  ;;  %v810_v1 = vld [vmem:[%s2120_s11 + $0x40] sm:$0xff] }
 0x1e4   : > { %1465 = vmatmul.msk.f32.vlgmr.msrb.gmra.mxu3 %vm835_vm2, %v2329_v6  ;;  %767 = vadd.xlane.f32.xlu2 %v766_v3  ;;  %v811_v6 = vld [vmem:[%s2120_s11 + $0x48] sm:$0xff]  ;;  %vm842_vm1 = vcmp.ge.f32.partialorder %v810_v1, 0.009  ;;  %v799_v3 = vadd.f32 %v2382_v26, %v2378_v2 }
 0x1e5   : > { %761 = vadd.xlane.f32.xlu0 %v760_v23  ;;  %vm843_vm2 = vcmp.ge.f32.partialorder %v811_v6, 0.009 }
 0x1e7   : > { %v1661_v51 = vpop.eup %1660 }
 0x1e8   : > { %v1663_v18 = vpop.eup %1662 }
 0x1e9   : > { %1420 = vmatmul.msk.f32.gmra.mxu0 %vm840_vm14, %v2364_v62  ;;  %v769_v12 = vadd.f32 %v1663_v18, %v1661_v51 }
 0x1ea   : > { %1436 = vmatmul.msk.f32.gmra.mxu1 %vm841_vm12, %v2369_v20  ;;  %782 = vadd.xlane.f32.xlu1 %v781_v21 }
 0x1eb   : > { %1450 = vmatmul.msk.f32.gmra.mxu2 %vm836_vm0, %v1645_v14  ;;  %v812_v14 = vld [vmem:[%s2120_s11 + $0x50] sm:$0xff] }
 0x1ec   : > { %1466 = vmatmul.msk.f32.gmra.mxu3 %vm837_vm3, %v1647_v17  ;;  %776 = vadd.xlane.f32.xlu2 %v775_v54  ;;  %v813_v17 = vld [vmem:[%s2120_s11 + $0x58] sm:$0xff]  ;;  %vm844_vm0 = vcmp.ge.f32.partialorder %v812_v14, 0.009  ;;  %s1712_s11 = scalar_lea.hbm %s1711_s10, 256 }
 0x1ed   : > { %770 = vadd.xlane.f32.xlu0 %v769_v12  ;;  %vm845_vm3 = vcmp.ge.f32.partialorder %v813_v17, 0.009  ;;  %p1713_p0 = scmp.ne.s32.totalorder %s1711_s10, %s1712_s11  ;;  %p1718_p5 = scmp.lt.s32.totalorder %s1716_s14, %s1712_s11 }
 0x1ef   : > { %p1714_p1 = pnand %p1713_p0, %p1878_p3  ;;  %p1719_p6 = por %p1718_p5, %p1717_p4 }
 0x1f1   : > { %1421 = vmatmul.msk.f32.gmra.mxu0 %vm842_vm1, %v2394_v53  ;;  %p1715_p2 = pneg %p1714_p1 }
 0x1f2   : > { %1437 = vmatmul.msk.f32.gmra.mxu1 %vm843_vm2, %v2396_v0  ;;  %791 = vadd.xlane.f32.xlu1 %v790_v16 }
 0x1f3   : > { %1451 = vmatmul.msk.f32.gmra.mxu2 %vm838_vm13, %v1657_v19  ;;  %v796_v19 = vadd.f32 %v2342_v10, %v2335_v15  ;;  %vm2739_vm13 = vcmp.ge.f32.partialorder %v2321_v31, 0.009  ;;  %p1720_p7 = pnand %p1719_p6, %p1715_p2 }
 0x1f4   : > { %1467 = vmatmul.msk.f32.gmra.mxu3 %vm839_vm15, %v1659_v22  ;;  %785 = vadd.xlane.f32.xlu2 %v784_v25  ;;  %vm2741_vm15 = vcmp.ge.f32.partialorder %v2367_v5, 0.009 }
 0x1f5   : > { %779 = vadd.xlane.f32.xlu0 %v778_v50 }
 0x1f9   : > { %1422 = vmatmul.msk.f32.gmra.mxu0 %vm844_vm0, %v1661_v51 }
 0x1fa   : > { %1438 = vmatmul.msk.f32.gmra.mxu1 %vm845_vm3, %v1663_v18  ;;  %800 = vadd.xlane.f32.xlu1 %v799_v3 }
 0x1fb   : > { %1452 = vmatmul.msk.f32.gmra.mxu2 %vm840_vm14, %v2364_v62  ;;  %vm2740_vm14 = vcmp.ge.f32.partialorder %v2362_v56, 0.009 }
 0x1fc   : > { %1468 = vmatmul.msk.f32.gmra.mxu3 %vm841_vm12, %v2369_v20  ;;  %794 = vadd.xlane.f32.xlu2 %v793_v41  ;;  %vm2738_vm12 = vcmp.ge.f32.partialorder %v2310_v13, 0.009 }
 0x1fd   : > { %788 = vadd.xlane.f32.xlu0 %v787_v44 }
 0x203   : > { %1453 = vmatmul.msk.f32.gmra.mxu2 %vm842_vm1, %v2394_v53 }
 0x204   : > { %1469 = vmatmul.msk.f32.gmra.mxu3 %vm843_vm2, %v2396_v0 }
 0x205   : > { %797 = vadd.xlane.f32.xlu0 %v796_v19 }
 0x20b   : > { %1454 = vmatmul.msk.f32.gmra.mxu2 %vm844_vm0, %v1661_v51 }
 0x20c   : > { %1470 = vmatmul.msk.f32.gmra.mxu3 %vm845_vm3, %v1663_v18 }
 0x212   : > { %v933_v62 = vpop.f32.mrf.mxu2 }
 0x213   : > { %1455 = vmatmul.msk.f32.gmra.mxu2 %vm846_vm4, %v2134_v38  ;;  %v998_v20 = vpop.f32.mrf.mxu3  ;;  %vm2730_vm4 = vcmp.ge.f32.partialorder %v2215_v36, 0.009 }
 0x214   : > { %1471 = vmatmul.msk.f32.gmra.mxu3 %vm847_vm5, %v2136_v47  ;;  %v2466_v53 = vadd.f32 %v998_v20, %v933_v62  ;;  %vm2731_vm5 = vcmp.ge.f32.partialorder %v2218_v37, 0.009 }
 0x21a   : > { %v936_v22 = vpop.f32.mrf.mxu2 }
 0x21b   : > { %1456 = vmatmul.msk.f32.gmra.mxu2 %vm848_vm6, %v2158_v57  ;;  %v1001_v0 = vpop.f32.mrf.mxu3  ;;  %vm2732_vm6 = vcmp.ge.f32.partialorder %v2239_v40, 0.009 }
 0x21c   : > { %1472 = vmatmul.msk.f32.gmra.mxu3 %vm849_vm7, %v2160_v60  ;;  %v2474_v23 = vadd.f32 %v1001_v0, %v936_v22  ;;  %vm2733_vm7 = vcmp.ge.f32.partialorder %v2242_v63, 0.009 }
 0x222   : > { %v939_v11 = vpop.f32.mrf.mxu2 }
 0x223   : > { %1457 = vmatmul.msk.f32.gmra.mxu2 %vm850_vm8, %v2180_v4  ;;  %v1004_v29 = vpop.f32.mrf.mxu3  ;;  %vm2734_vm8 = vcmp.ge.f32.partialorder %v2261_v43, 0.009 }
 0x224   : > { %1473 = vmatmul.msk.f32.gmra.mxu3 %vm851_vm9, %v2182_v7  ;;  %v2482_v38 = vadd.f32 %v1004_v29, %v939_v11  ;;  %vm2735_vm9 = vcmp.ge.f32.partialorder %v2264_v24, 0.009 }
 0x22a   : > { %v2484_v47 = vpop.f32.mrf.mxu2 }
 0x22b   : > { %1458 = vmatmul.msk.f32.gmra.mxu2 %vm852_vm10, %v2204_v35  ;;  %v2489_v27 = vpop.f32.mrf.mxu3  ;;  %vm2736_vm10 = vcmp.ge.f32.partialorder %v2285_v45, 0.009 }
 0x22c   : > { %1474 = vmatmul.msk.f32.gmra.mxu3 %vm853_vm11, %v2206_v28  ;;  %vm2737_vm11 = vcmp.ge.f32.partialorder %v2288_v46, 0.009  ;;  %v1008_v16 = vadd.f32 %v2489_v27, %v2484_v47 }
 0x232   : > { %v2494_v49 = vpop.f32.mrf.mxu2 }
 0x233   : > { %1459 = vmatmul.msk.f32.gmra.mxu2 %vm2730_vm4, %v2228_v59  ;;  %v2499_v57 = vpop.f32.mrf.mxu3 }
 0x234   : > { %1475 = vmatmul.msk.f32.gmra.mxu3 %vm2731_vm5, %v2230_v39 }
 0x23a   : > { %v2504_v60 = vpop.f32.mrf.mxu2 }
 0x23b   : > { %1460 = vmatmul.msk.f32.gmra.mxu2 %vm2732_vm6, %v2250_v8  ;;  %v2509_v30 = vpop.f32.mrf.mxu3 }
 0x23c   : > { %1476 = vmatmul.msk.f32.gmra.mxu3 %vm2733_vm7, %v2252_v42 }
 0x242   : > { %v2514_v61 = vpop.f32.mrf.mxu2 }
 0x243   : > { %1461 = vmatmul.msk.f32.gmra.mxu2 %vm2734_vm8, %v2274_v52  ;;  %v2519_v4 = vpop.f32.mrf.mxu3 }
 0x244   : > { %1477 = vmatmul.msk.f32.gmra.mxu3 %vm2735_vm9, %v2276_v58 }
 0x245   : > { %v756_v7 = vpop.xlane.xlu1 %755 }
 0x246   : > { %1664 = vrcp.f32 %v756_v7 }
 0x24a   : > { %v2525_v33 = vpop.f32.mrf.mxu2 }
 0x24b   : > { %1462 = vmatmul.msk.f32.gmra.mxu2 %vm2736_vm10, %v2296_v34  ;;  %v2530_v9 = vpop.f32.mrf.mxu3 }
 0x24c   : > { %v1665_v35 = vpop.eup %1664  ;;  %1478 = vmatmul.msk.f32.gmra.mxu3 %vm2737_vm11, %v2298_v32  ;;  %v915_v28 = vpop.f32.mrf.mxu0 }
 0x24d   : > { %v2537_v36 = vmul.f32 1.0090817, %v1665_v35  ;;  %v980_v37 = vpop.f32.mrf.mxu1  ;;  %v765_v59 = vpop.xlane.xlu1 %764 }
 0x24e   : > { %v981_v39 = vadd.f32 %v980_v37, %v915_v28  ;;  %v1017_v28 = vadd.f32 %v2519_v4, %v2514_v61 }
 0x24f   : > { %v759_v40 = vpop.xlane.xlu2 %758 }
 0x250   : > { %1666 = vrcp.f32 %v759_v40  ;;  %v1190_v63 = vmul.f32 %v2537_v36, %v981_v39 }
 0x252   : > { %1222 = vst [vmem:[%s2540_s16] sm:$0xff] %v1190_v63 }
 0x253   : > { %1463 = vmatmul.msk.f32.gmra.mxu2 %vm2738_vm12, %v2335_v15 }
 0x254   : > { %1479 = vmatmul.msk.f32.gmra.mxu3 %vm2739_vm13, %v2342_v10  ;;  %v2549_v8 = vpop.f32.mrf.mxu2 }
 0x255   : > { %v2551_v42 = vpop.f32.mrf.mxu3  ;;  %v774_v43 = vpop.xlane.xlu1 %773 }
 0x256   : > { %v1667_v24 = vpop.eup %1666  ;;  %1668 = vrcp.f32 %v774_v43  ;;  %v918_v52 = vpop.f32.mrf.mxu0 }
 0x257   : > { %v2553_v58 = vmul.f32 1.0090817, %v1667_v24  ;;  %v983_v45 = vpop.f32.mrf.mxu1  ;;  %v768_v46 = vpop.xlane.xlu2 %767 }
 0x258   : > { %v984_v34 = vadd.f32 %v983_v45, %v918_v52  ;;  %v762_v32 = vpop.xlane.xlu0 %761 }
 0x259   : > { %1670 = vrcp.f32 %v762_v32 }
 0x25a   : > { %v1192_v13 = vmul.f32 %v2553_v58, %v984_v34 }
 0x25b   : > { %1464 = vmatmul.msk.f32.gmra.mxu2 %vm2740_vm14, %v2378_v2 }
 0x25c   : > { %v1669_v31 = vpop.eup %1668  ;;  %1224 = vst [vmem:[%s2540_s16 + $0x10] sm:$0xff] %v1192_v13  ;;  %1480 = vmatmul.msk.f32.gmra.mxu3 %vm2741_vm15, %v2382_v26 }
 0x25d   : > { %v2563_v15 = vmul.f32 1.0090817, %v1669_v31  ;;  %v783_v10 = vpop.xlane.xlu1 %782 }
 0x25e   : > { %v2565_v55 = vpop.f32.mrf.mxu2  ;;  %1672 = vrcp.f32 %v783_v10  ;;  %v921_v48 = vpop.f32.mrf.mxu0 }
 0x25f   : > { %v1671_v51 = vpop.eup %1670  ;;  %1674 = vrcp.f32 %v765_v59  ;;  %v1202_v56 = vmul.f32 %v2563_v15, %v2466_v53  ;;  %v2569_v2 = vpop.f32.mrf.mxu3 }
 0x260   : > { %v777_v18 = vpop.xlane.xlu2 %776  ;;  %v2571_v21 = vmul.f32 1.0090817, %v1671_v51  ;;  %v986_v5 = vpop.f32.mrf.mxu1 }
 0x261   : > { %1676 = vrcp.f32 %v777_v18  ;;  %v771_v26 = vpop.xlane.xlu0 %770  ;;  %1234 = vst [vmem:[%s2540_s16 + $0x60] sm:$0xff] %v1202_v56  ;;  %v987_v12 = vadd.f32 %v986_v5, %v921_v48  ;;  %v1026_v56 = vadd.f32 %v2569_v2, %v2565_v55  ;;  %v1014_v55 = vadd.f32 %v2509_v30, %v2504_v60 }
 0x263   : > { %v1194_v54 = vmul.f32 %v2571_v21, %v987_v12 }
 0x264   : > { %v1673_v1 = vpop.eup %1672 }
 0x265   : > { %v1675_v6 = vpop.eup %1674  ;;  %v2577_v25 = vmul.f32 1.0090817, %v1673_v1  ;;  %1226 = vst [vmem:[%s2540_s16 + $0x20] sm:$0xff] %v1194_v54  ;;  %v792_v50 = vpop.xlane.xlu1 %791 }
 0x266   : > { %v1045_v17 = vpop.f32.mrf.mxu2  ;;  %1678 = vrcp.f32 %v792_v50  ;;  %v924_v3 = vpop.f32.mrf.mxu0  ;;  %v2583_v0 = vmul.f32 1.0090817, %v1675_v6 }
 0x267   : > { %v1677_v14 = vpop.eup %1676  ;;  %1680 = vrcp.f32 %v768_v46  ;;  %v1208_v41 = vmul.f32 %v2577_v25, %v1008_v16  ;;  %v1110_v19 = vpop.f32.mrf.mxu3 }
 0x268   : > { %v2581_v44 = vmul.f32 1.0090817, %v1677_v14  ;;  %v786_v62 = vpop.xlane.xlu2 %785  ;;  %v1111_v20 = vadd.f32 %v1110_v19, %v1045_v17  ;;  %v989_v53 = vpop.f32.mrf.mxu1 }
 0x269   : > { %1682 = vrcp.f32 %v786_v62  ;;  %v780_v22 = vpop.xlane.xlu0 %779  ;;  %1240 = vst [vmem:[%s2540_s16 + $0x90] sm:$0xff] %v1208_v41  ;;  %v990_v29 = vadd.f32 %v989_v53, %v924_v3 }
 0x26a   : > { %v1204_v11 = vmul.f32 %v2581_v44, %v2474_v23  ;;  %1684 = vrcp.f32 %v780_v22  ;;  %v1191_v47 = vmul.f32 %v2537_v36, %v1111_v20  ;;  %v1011_v36 = vadd.f32 %v2499_v57, %v2494_v49 }
 0x26b   : > { %v1196_v27 = vmul.f32 %v2583_v0, %v990_v29  ;;  %v1023_v20 = vadd.f32 %v2551_v42, %v2549_v8 }
 0x26c   : > { %1236 = vst [vmem:[%s2540_s16 + $0x70] sm:$0xff] %v1204_v11  ;;  %v1679_v7 = vpop.eup %1678 }
 0x26d   : > { %1223 = vst [vmem:[%s2540_s16 + $0x8] sm:$0xff] %v1191_v47  ;;  %v1681_v35 = vpop.eup %1680  ;;  %v2594_v37 = vmul.f32 1.0090817, %v1679_v7  ;;  %v801_v59 = vpop.xlane.xlu1 %800 }
 0x26e   : > { %1228 = vst [vmem:[%s2540_s16 + $0x30] sm:$0xff] %v1196_v27  ;;  %v1048_v40 = vpop.f32.mrf.mxu2  ;;  %1686 = vrcp.f32 %v801_v59  ;;  %v927_v23 = vpop.f32.mrf.mxu0  ;;  %v1178_v32 = vmul.f32 1.0090817, %v1681_v35 }
 0x26f   : > { %v1683_v39 = vpop.eup %1682  ;;  %1688 = vrcp.f32 %v771_v26  ;;  %v1214_v43 = vmul.f32 %v2594_v37, %v1017_v28  ;;  %v1113_v61 = vpop.f32.mrf.mxu3 }
 0x270   : > { %v1685_v63 = vpop.eup %1684  ;;  %v2600_v24 = vmul.f32 1.0090817, %v1683_v39  ;;  %v795_v4 = vpop.xlane.xlu2 %794  ;;  %v1114_v45 = vadd.f32 %v1113_v61, %v1048_v40 }
 0x271   : > { %v2602_v52 = vmul.f32 1.0090817, %v1685_v63  ;;  %1690 = vrcp.f32 %v795_v4  ;;  %v992_v46 = vpop.f32.mrf.mxu1  ;;  %v789_v34 = vpop.xlane.xlu0 %788  ;;  %1246 = vst [vmem:[%s2540_s16 + $0xc0] sm:$0xff] %v1214_v43 }
 0x272   : > { %v1210_v49 = vmul.f32 %v2600_v24, %v1011_v36  ;;  %v993_v57 = vadd.f32 %v992_v46, %v927_v23  ;;  %1692 = vrcp.f32 %v789_v34  ;;  %v1193_v31 = vmul.f32 %v2553_v58, %v1114_v45 }
 0x273   : > { %v1206_v13 = vmul.f32 %v2602_v52, %v2482_v38  ;;  %v1020_v38 = vadd.f32 %v2530_v9, %v2525_v33 }
 0x274   : > { %1242 = vst [vmem:[%s2540_s16 + $0xa0] sm:$0xff] %v1210_v49  ;;  %v1198_v10 = vmul.f32 %v1178_v32, %v993_v57  ;;  %v1687_v48 = vpop.eup %1686 }
 0x275   : > { %1238 = vst [vmem:[%s2540_s16 + $0x80] sm:$0xff] %v1206_v13  ;;  %v1689_v51 = vpop.eup %1688  ;;  %v2614_v18 = vmul.f32 1.0090817, %v1687_v48 }
 0x276   : > { %1225 = vst [vmem:[%s2540_s16 + $0x18] sm:$0xff] %v1193_v31  ;;  %v1051_v26 = vpop.f32.mrf.mxu2  ;;  %v930_v12 = vpop.f32.mrf.mxu0  ;;  %v1179_v17 = vmul.f32 1.0090817, %v1689_v51 }
 0x277   : > { %v1691_v5 = vpop.eup %1690  ;;  %1230 = vst [vmem:[%s2540_s16 + $0x40] sm:$0xff] %v1198_v10  ;;  %v1220_v1 = vmul.f32 %v2614_v18, %v1026_v56  ;;  %v1116_v6 = vpop.f32.mrf.mxu3 }
 0x278   : > { %v1693_v54 = vpop.eup %1692  ;;  %v2619_v58 = vmul.f32 1.0090817, %v1691_v5  ;;  %v1117_v16 = vadd.f32 %v1116_v6, %v1051_v26 }
 0x279   : > { %v2624_v2 = vmul.f32 1.0090817, %v1693_v54  ;;  %v995_v50 = vpop.f32.mrf.mxu1  ;;  %v798_v14 = vpop.xlane.xlu0 %797  ;;  %1252 = vst [vmem:[%s2540_s16 + $0xf0] sm:$0xff] %v1220_v1 }
 0x27a   : > { %v1216_v33 = vmul.f32 %v2619_v58, %v1020_v38  ;;  %v996_v9 = vadd.f32 %v995_v50, %v930_v12  ;;  %1694 = vrcp.f32 %v798_v14  ;;  %v1195_v41 = vmul.f32 %v2571_v21, %v1117_v16 }
 0x27b   : > { %v1212_v3 = vmul.f32 %v2624_v2, %v1014_v55 }
 0x27c   : > { %1248 = vst [vmem:[%s2540_s16 + $0xd0] sm:$0xff] %v1216_v33  ;;  %v1200_v60 = vmul.f32 %v1179_v17, %v996_v9 }
 0x27d   : > { %1244 = vst [vmem:[%s2540_s16 + $0xb0] sm:$0xff] %v1212_v3 }
 0x27e   : > { %1227 = vst [vmem:[%s2540_s16 + $0x28] sm:$0xff] %v1195_v41  ;;  %v1054_v30 = vpop.f32.mrf.mxu2 }
 0x27f   : > { %1232 = vst [vmem:[%s2540_s16 + $0x50] sm:$0xff] %v1200_v60  ;;  %v1119_v62 = vpop.f32.mrf.mxu3 }
 0x280   : > { %v1695_v19 = vpop.eup %1694  ;;  %v1120_v22 = vadd.f32 %v1119_v62, %v1054_v30 }
 0x281   : > { %v2636_v53 = vmul.f32 1.0090817, %v1695_v19 }
 0x282   : > { %v1197_v21 = vmul.f32 %v2583_v0, %v1120_v22 }
 0x283   : > { %v1218_v11 = vmul.f32 %v2636_v53, %v1023_v20 }
 0x284   : > { %1229 = vst [vmem:[%s2540_s16 + $0x38] sm:$0xff] %v1197_v21 }
 0x285   : > { %1250 = vst [vmem:[%s2540_s16 + $0xe0] sm:$0xff] %v1218_v11 }
 0x286   : > { %v1057_v29 = vpop.f32.mrf.mxu2 }
 0x287   : > { %v1122_v47 = vpop.f32.mrf.mxu3 }
 0x288   : > { %v1123_v27 = vadd.f32 %v1122_v47, %v1057_v29 }
 0x28a   : > { %v1199_v7 = vmul.f32 %v1178_v32, %v1123_v27 }
 0x28c   : > { %1231 = vst [vmem:[%s2540_s16 + $0x48] sm:$0xff] %v1199_v7 }
 0x28e   : > { %v1060_v35 = vpop.f32.mrf.mxu2 }
 0x28f   : > { %v1125_v28 = vpop.f32.mrf.mxu3 }
 0x290   : > { %v1126_v8 = vadd.f32 %v1125_v28, %v1060_v35 }
 0x292   : > { %v1201_v42 = vmul.f32 %v1179_v17, %v1126_v8 }
 0x294   : > { %1233 = vst [vmem:[%s2540_s16 + $0x58] sm:$0xff] %v1201_v42 }
 0x296   : > { %v1063_v59 = vpop.f32.mrf.mxu2 }
 0x297   : > { %v1128_v39 = vpop.f32.mrf.mxu3 }
 0x298   : > { %v1129_v40 = vadd.f32 %v1128_v39, %v1063_v59 }
 0x29a   : > { %v1203_v0 = vmul.f32 %v2563_v15, %v1129_v40 }
 0x29c   : > { %1235 = vst [vmem:[%s2540_s16 + $0x68] sm:$0xff] %v1203_v0 }
 0x29e   : > { %v1066_v23 = vpop.f32.mrf.mxu2 }
 0x29f   : > { %v1131_v63 = vpop.f32.mrf.mxu3 }
 0x2a0   : > { %v1132_v36 = vadd.f32 %v1131_v63, %v1066_v23 }
 0x2a2   : > { %v1205_v43 = vmul.f32 %v2581_v44, %v1132_v36 }
 0x2a4   : > { %1237 = vst [vmem:[%s2540_s16 + $0x78] sm:$0xff] %v1205_v43 }
 0x2a6   : > { %v1069_v61 = vpop.f32.mrf.mxu2 }
 0x2a7   : > { %v1134_v4 = vpop.f32.mrf.mxu3 }
 0x2a8   : > { %v1135_v45 = vadd.f32 %v1134_v4, %v1069_v61 }
 0x2aa   : > { %v1207_v46 = vmul.f32 %v2602_v52, %v1135_v45 }
 0x2ac   : > { %1239 = vst [vmem:[%s2540_s16 + $0x88] sm:$0xff] %v1207_v46 }
 0x2ae   : > { %v1072_v34 = vpop.f32.mrf.mxu2 }
 0x2af   : > { %v1137_v32 = vpop.f32.mrf.mxu3 }
 0x2b0   : > { %v1138_v49 = vadd.f32 %v1137_v32, %v1072_v34 }
 0x2b2   : > { %v1209_v15 = vmul.f32 %v2577_v25, %v1138_v49 }
 0x2b4   : > { %1241 = vst [vmem:[%s2540_s16 + $0x98] sm:$0xff] %v1209_v15 }
 0x2b6   : > { %v1075_v57 = vpop.f32.mrf.mxu2 }
 0x2b7   : > { %v1140_v13 = vpop.f32.mrf.mxu3 }
 0x2b8   : > { %v1141_v31 = vadd.f32 %v1140_v13, %v1075_v57 }
 0x2ba   : > { %v1211_v44 = vmul.f32 %v2600_v24, %v1141_v31 }
 0x2bc   : > { %1243 = vst [vmem:[%s2540_s16 + $0xa8] sm:$0xff] %v1211_v44 }
 0x2be   : > { %v1078_v10 = vpop.f32.mrf.mxu2 }
 0x2bf   : > { %v1143_v52 = vpop.f32.mrf.mxu3 }
 0x2c0   : > { %v1144_v48 = vadd.f32 %v1143_v52, %v1078_v10 }
 0x2c2   : > { %v1213_v51 = vmul.f32 %v2624_v2, %v1144_v48 }
 0x2c4   : > { %1245 = vst [vmem:[%s2540_s16 + $0xb8] sm:$0xff] %v1213_v51 }
 0x2c6   : > { %v1081_v56 = vpop.f32.mrf.mxu2 }
 0x2c7   : > { %v1146_v5 = vpop.f32.mrf.mxu3 }
 0x2c8   : > { %v1147_v25 = vadd.f32 %v1146_v5, %v1081_v56 }
 0x2ca   : > { %v1215_v26 = vmul.f32 %v2594_v37, %v1147_v25 }
 0x2cc   : > { %1247 = vst [vmem:[%s2540_s16 + $0xc8] sm:$0xff] %v1215_v26 }
 0x2ce   : > { %v1084_v12 = vpop.f32.mrf.mxu2 }
 0x2cf   : > { %v1149_v24 = vpop.f32.mrf.mxu3 }
 0x2d0   : > { %v1150_v54 = vadd.f32 %v1149_v24, %v1084_v12 }
 0x2d2   : > { %v1217_v38 = vmul.f32 %v2619_v58, %v1150_v54 }
 0x2d4   : > { %1249 = vst [vmem:[%s2540_s16 + $0xd8] sm:$0xff] %v1217_v38 }
 0x2d6   : > { %v1087_v1 = vpop.f32.mrf.mxu2 }
 0x2d7   : > { %v1152_v6 = vpop.f32.mrf.mxu3 }
 0x2d8   : > { %v1153_v55 = vadd.f32 %v1152_v6, %v1087_v1 }
 0x2da   : > { %v1219_v37 = vmul.f32 %v2636_v53, %v1153_v55 }
 0x2dc   : > { %1251 = vst [vmem:[%s2540_s16 + $0xe8] sm:$0xff] %v1219_v37 }
 0x2de   : > { %v1090_v2 = vpop.f32.mrf.mxu2 }
 0x2df   : > { %v1155_v58 = vpop.f32.mrf.mxu3 }
 0x2e0   : > { %v1156_v16 = vadd.f32 %v1155_v58, %v1090_v2 }
 0x2e2   : > { %v1221_v50 = vmul.f32 %v2614_v18, %v1156_v16 }
 0x2e4   : > { %1253 = vst [vmem:[%s2540_s16 + $0xf8] sm:$0xff] %v1221_v50 }
 0x2e5   : > { %1723 = shalt.err (!%p1720_p7)
}
 0x2e6   : > { %s1792_s6 = smov 256   ;;  %s1793_s16 = smov 16  }
 0x2e7   : > { %1525 = dma.vmem_to_hbm [thread:$0]  (%p1878_p3), %s1271_s9, 4096, %s1273_s23, %s1255_s24, %s1792_s6, %s1792_s6, %s1793_s16  }
 0x2e8 PF: > { %p1531_p9 = scmp.ge.s32.totalorder %s1790_s27, 2  ;;  %s1287_s0 = sand.u32 1, %s1762_s20  }
 0x2e9   : > { %s1288_s28 = scalar_lea.sflag [#allocation4], %s1287_s0 }
 0x2ea   : > { %p1528_p10 = pnand %p1531_p9, %p1887_p8 }
 0x2ec   : > { %p1529_p11 = pneg %p1528_p10 }
 0x2ee   : > { %1757 = dma.done.wait (%p1529_p11), %s1288_s28, 4096  }
 0x2ef   : > { %1759 = vsyncadd (%p1529_p11), %s1288_s28, 4294963200  ;;  %s19_s27 = sadd.s32 1, %s1790_s27   ;;  %s2742_s20 = smov %s1766_s21 }
 0x2f0   : > { %p16_p12 = scmp.ge.s32.totalorder %s19_s27, 6   ;;  %s2743_s21 = smov %s1770_s22 }
 0x2f1   : > { %s2744_s22 = smov %s1896_s12  ;;  %s2745_s23 = smov %s1782_s25 }
 0x2f2   : > { %s2746_s24 = smov %s1786_s26  ;;  %s2747_s25 = smov %s2750_s29 }
 0x2f3   : > { %s2748_s26 = smov %s2754_s30  ;;  %18 = sbr.rel (!%p16_p12) target bundleno = 7 (0x7), region = 84 }
 0x2f8   :  { %1294 = vsyncpa [#allocation4], 1 }
 0x2f9   :  { %1296 = vsyncpa [#allocation4 + $0x1], 1 }

</bundles_post_ra>
